<compile_context>
chip_gen: v7x
topology: tpu7x:2x2x1
jax: 0.10.0
libtpu: 0.0.40
codegen_flags: <defaults>
</compile_context>

<pallas_src>
import functools
import math

import jax
import jax.numpy as jnp
from jax.experimental import pallas as pl
from jax.experimental.pallas import tpu as pltpu


# ---------------------------------------------------------------------------
# Kernel
# ---------------------------------------------------------------------------
def _dwconv_kernel(x_ref, w_ref, b_ref, o_ref, *, width, height, rows_per_chunk):
    """One (channel-tile, batch) block: depthwise 3x3 conv + bias.

    x_ref: (1, N, Ct) tokens of one image / one channel tile (N = H * W).
    w_ref: (3, 3, Ct) depthwise taps, w[i, j, c] == torch weight[c, 0, i, j].
    b_ref: (1, Ct) bias.
    o_ref: (1, N, Ct) output block.

    The token axis is processed in chunks of `rows_per_chunk` image rows so
    the live f32/bf16 intermediates stay small regardless of N.
    """
    W = width
    H = height
    TH = rows_per_chunk
    N = H * W
    CH = TH * W                       # tokens per chunk
    E = (TH + 2) * W                  # chunk + one halo row above and below
    n_chunks = H // TH
    ct = x_ref.shape[2]

    cdt = x_ref.dtype                 # tap-math dtype (bf16 in -> bf16 math)
    # Depthwise taps, hoisted out of the chunk loop (loop-invariant).
    k = [[w_ref[i, j].astype(cdt) for j in range(3)] for i in range(3)]
    bias = b_ref[...].astype(jnp.float32)                       # (1, Ct)

    # Column-within-row index over the extended chunk; marks where the
    # wrapped rolls must be zeroed (== the conv's zero padding).
    col = jax.lax.broadcasted_iota(jnp.int32, (E, 1), 0) % W
    left_ok = col >= 1                # token has a left neighbour in its row
    right_ok = col <= W - 2           # token has a right neighbour in its row

    zero_row = jnp.zeros((W, ct), cdt)

    def chunk_body(c, carry):
        start = c * CH
        if not isinstance(start, int):
            start = pl.multiple_of(start, CH)

        xc = x_ref[0, pl.ds(start, CH), :]                      # (CH, Ct)

        # Halo rows: clamp the load address, then mask at the image edges
        # (these positions are the conv's zero padding).
        above_start = jnp.maximum(start - W, 0)
        above = x_ref[0, pl.ds(above_start, W), :]
        above = jnp.where(start > 0, above, zero_row)
        below_start = jnp.minimum(start + CH, N - W)
        below = x_ref[0, pl.ds(below_start, W), :]
        below = jnp.where(start + CH < N, below, zero_row)

        xe = jnp.concatenate([above, xc, below], axis=0)        # (E, Ct)

        # Horizontal neighbours (dx = -1 / +1) via sublane roll + edge mask.
        # The rolls wrap across row boundaries, but exactly those positions
        # are masked to zero, so the wrap is harmless.
        x_m = jnp.where(left_ok, pltpu.roll(xe, shift=1, axis=0), 0)       # x[., w-1]
        x_p = jnp.where(right_ok, pltpu.roll(xe, shift=E - 1, axis=0), 0)  # x[., w+1]

        # Horizontal partial sums per kernel row (i = 0/1/2 <-> dy = -1/0/+1),
        # in the input dtype (bf16 on v6e/v7x halves VALU pressure).
        p0 = xe * k[0][1] + x_m * k[0][0] + x_p * k[0][2]
        p1 = xe * k[1][1] + x_m * k[1][0] + x_p * k[1][2]
        p2 = xe * k[2][1] + x_m * k[2][0] + x_p * k[2][2]

        # Vertical combine: output row h takes p0 from row h-1, p1 from row h,
        # p2 from row h+1 — static slices of the extended chunk, accumulated
        # in f32, plus bias.
        acc = (p0[0:CH].astype(jnp.float32)
               + p1[W:W + CH].astype(jnp.float32)
               + p2[2 * W:2 * W + CH].astype(jnp.float32)
               + bias)
        o_ref[0, pl.ds(start, CH), :] = acc.astype(o_ref.dtype)
        return carry

    if n_chunks == 1:
        chunk_body(0, None)
    else:
        jax.lax.fori_loop(0, n_chunks, chunk_body, None, unroll=(n_chunks <= 8))


# ---------------------------------------------------------------------------
# Tile planning (VMEM-aware, per generation)
# ---------------------------------------------------------------------------
def _vmem_caps():
    """(budget for pipeline buffers + temporaries, cap for vmem_limit_bytes)."""
    vmem = None
    try:
        vmem = int(pltpu.get_tpu_info().vmem_capacity_bytes)
    except Exception:
        pass
    if vmem is None:
        kind = ""
        try:
            kind = jax.devices()[0].device_kind.lower()
        except Exception:
            pass
        # v5e / v6e have 128 MiB of VMEM per TensorCore; be conservative
        # (64 MiB, i.e. v7x-safe) for anything unknown.
        vmem = (128 << 20) if ("v5" in kind or "v6" in kind) else (64 << 20)
    budget = int(vmem * 0.62)         # ~40 MiB on v7x, ~80 MiB on v5e/v6e
    cap = int(vmem * 0.75)            # ~48 MiB on v7x, ~96 MiB on v5e/v6e
    return budget, cap


def _plan_tiles(B, H, W, C, x_dtype):
    """Pick (channel_tile, rows_per_chunk, vmem_limit_bytes)."""
    N = H * W
    itemsize = jnp.dtype(x_dtype).itemsize
    budget, cap = _vmem_caps()

    # Row-chunk size: ~512 tokens per chunk, divisor of H, prefer chunks whose
    # token count is a multiple of 8 (sublane-aligned loads/stores).
    row_cap = max(1, 512 // W)
    divs = [d for d in range(1, H + 1) if H % d == 0 and d <= row_cap] or [1]
    aligned = [d for d in divs if (d * W) % 8 == 0]
    TH = max(aligned) if aligned else max(divs)

    # Candidate channel tiles (lane-dense when C allows it).
    if C % 128 == 0:
        cands = [t for t in range(128, C + 1, 128) if C % t == 0]
    else:
        cands = [t for t in range(1, C + 1) if C % t == 0]
    if B == 1:
        # Keep >=2 grid steps on a parallel axis so both v7x TCs get work.
        halved = [t for t in cands if C // t >= 2]
        if halved:
            cands = halved

    def need_bytes(ct):
        io = 4 * N * ct * itemsize                      # 2x dbl-buffered in + 2x out blocks
        params = 2 * (9 + 8) * ct * 4                   # weight + bias blocks (padded, generous)
        tmp = 7 * (TH + 2) * W * ct * 4                 # xe/xm/xp/p0/p1/p2/acc, f32 worst case
        return io + params + tmp

    ct = None
    for t in sorted(cands, reverse=True):               # biggest tile that fits
        if need_bytes(t) <= budget:
            ct = t
            break
    if ct is None:
        # Even the smallest channel tile exceeds the budget (very large N).
        # TODO(synk): add a grid axis over row tiles (memory_space=pl.ANY +
        # manual halo DMA) so VMEM stays bounded for huge H*W as well.
        ct = min(cands)
    vmem_limit = int(min(max(need_bytes(ct) + (8 << 20), 32 << 20), cap))
    return ct, TH, vmem_limit


# ---------------------------------------------------------------------------
# Wrapper
# ---------------------------------------------------------------------------
def dwconv_forward(x, H, W, w, b, *, channel_tile=None, rows_per_chunk=None):
    """Depthwise 3x3 conv (stride 1, pad 1, groups=C) + bias on (B, N, C)."""
    B, N, C = x.shape
    assert N == H * W, "sequence length must equal H * W"
    assert w.shape == (3, 3, C) and b.shape == (C,)

    ct, TH, vmem_limit = _plan_tiles(B, H, W, C, x.dtype)
    if channel_tile is not None:
        ct = channel_tile
    if rows_per_chunk is not None:
        TH = rows_per_chunk
    assert C % ct == 0 and H % TH == 0

    # Batch innermost: weight/bias block indices are constant across
    # consecutive grid steps, so Pallas skips their re-DMA.
    grid = (C // ct, B)

    kernel = functools.partial(_dwconv_kernel, width=W, height=H,
                               rows_per_chunk=TH)
    return pl.pallas_call(
        kernel,
        out_shape=jax.ShapeDtypeStruct((B, N, C), x.dtype),
        grid=grid,
        in_specs=[
            pl.BlockSpec((1, N, ct), lambda ci, bi: (bi, 0, ci)),
            pl.BlockSpec((3, 3, ct), lambda ci, bi: (0, 0, ci)),
            pl.BlockSpec((1, ct), lambda ci, bi: (0, ci)),
        ],
        out_specs=pl.BlockSpec((1, N, ct), lambda ci, bi: (bi, 0, ci)),
        compiler_params=pltpu.CompilerParams(
            dimension_semantics=("parallel", "parallel"),
            vmem_limit_bytes=vmem_limit,
        ),
    )(x, w, b.reshape(1, C))


# ---------------------------------------------------------------------------
# Reference + self-test
# ---------------------------------------------------------------------------
def _reference_dwconv(x, H, W, w, b):
    """Pure-jnp f32 reference (pad + 9 shifted multiply-adds)."""
    B, N, C = x.shape
    xi = x.reshape(B, H, W, C).astype(jnp.float32)
    xp = jnp.pad(xi, ((0, 0), (1, 1), (1, 1), (0, 0)))
    out = jnp.zeros_like(xi)
    for i in range(3):
        for j in range(3):
            out = out + xp[:, i:i + H, j:j + W, :] * w[i, j].astype(jnp.float32)
    out = out + b.astype(jnp.float32)
    return out.reshape(B, N, C).astype(x.dtype)


if __name__ == "__main__":
    key = jax.random.PRNGKey(0)
    B, H, W = 2, 16, 16
    C = 128                      # small but lane-dense channel count
    N = H * W

    k0, k1, k2 = jax.random.split(key, 3)
    x = jax.random.normal(k0, (B, N, C), jnp.float32)

    # Depthwise Conv2d params. Layout (3, 3, C): w[i, j, c] == torch w[c, 0, i, j].
    # Weight init matches the module's scheme: N(0, sqrt(2 / fan_out)), fan_out = 9.
    w = jax.random.normal(k1, (3, 3, C), jnp.float32) * math.sqrt(2.0 / 9.0)
    b = jax.random.normal(k2, (C,), jnp.float32) * 0.02

    out = jax.block_until_ready(dwconv_forward(x, H, W, w, b))
    assert out.shape == (B, N, C)

    ref = _reference_dwconv(x, H, W, w, b)
    err = float(jnp.max(jnp.abs(out - ref)))
    assert err < 1e-4, f"max abs error {err}"

    print("KERNEL_OK")
</pallas_src>

<mosaic_0001>
module attributes {stable_mosaic.version = 11 : i64} {
  func.func @_dwconv_kernel(%arg0: i32, %arg1: i32, %arg2: memref<1x256x128xf32, #tpu.memory_space<vmem>>, %arg3: memref<3x3x128xf32, #tpu.memory_space<vmem>>, %arg4: memref<1x128xf32, #tpu.memory_space<vmem>>, %arg5: memref<1x256x128xf32, #tpu.memory_space<vmem>>) attributes {dimension_semantics = [#tpu.dimension_semantics<parallel>, #tpu.dimension_semantics<parallel>], iteration_bounds = array<i64: 1, 2>, scalar_prefetch = 0 : i64, scratch_operands = 0 : i64, tpu.core_type = #tpu.core_type<tc>, window_params = [{transform_indices = @transform_0, window_bounds = array<i64: 1, 256, 128>}, {transform_indices = @transform_1, window_bounds = array<i64: 3, 3, 128>}, {transform_indices = @transform_2, window_bounds = array<i64: 1, 128>}, {transform_indices = @transform_3, window_bounds = array<i64: 1, 256, 128>}]} {
    %c0 = arith.constant 0 : index
    %c0_0 = arith.constant 0 : index
    %c0_1 = arith.constant 0 : index
    %0 = vector.load %arg3[%c0, %c0_0, %c0_1] : memref<3x3x128xf32, #tpu.memory_space<vmem>>, vector<1x1x128xf32>
    %1 = vector.shape_cast %0 : vector<1x1x128xf32> to vector<128xf32>
    %c0_2 = arith.constant 0 : index
    %c1 = arith.constant 1 : index
    %c0_3 = arith.constant 0 : index
    %2 = vector.load %arg3[%c0_2, %c1, %c0_3] : memref<3x3x128xf32, #tpu.memory_space<vmem>>, vector<1x1x128xf32>
    %3 = vector.shape_cast %2 : vector<1x1x128xf32> to vector<128xf32>
    %c0_4 = arith.constant 0 : index
    %c2 = arith.constant 2 : index
    %c0_5 = arith.constant 0 : index
    %4 = vector.load %arg3[%c0_4, %c2, %c0_5] : memref<3x3x128xf32, #tpu.memory_space<vmem>>, vector<1x1x128xf32>
    %5 = vector.shape_cast %4 : vector<1x1x128xf32> to vector<128xf32>
    %c1_6 = arith.constant 1 : index
    %c0_7 = arith.constant 0 : index
    %c0_8 = arith.constant 0 : index
    %6 = vector.load %arg3[%c1_6, %c0_7, %c0_8] : memref<3x3x128xf32, #tpu.memory_space<vmem>>, vector<1x1x128xf32>
    %7 = vector.shape_cast %6 : vector<1x1x128xf32> to vector<128xf32>
    %c1_9 = arith.constant 1 : index
    %c1_10 = arith.constant 1 : index
    %c0_11 = arith.constant 0 : index
    %8 = vector.load %arg3[%c1_9, %c1_10, %c0_11] : memref<3x3x128xf32, #tpu.memory_space<vmem>>, vector<1x1x128xf32>
    %9 = vector.shape_cast %8 : vector<1x1x128xf32> to vector<128xf32>
    %c1_12 = arith.constant 1 : index
    %c2_13 = arith.constant 2 : index
    %c0_14 = arith.constant 0 : index
    %10 = vector.load %arg3[%c1_12, %c2_13, %c0_14] : memref<3x3x128xf32, #tpu.memory_space<vmem>>, vector<1x1x128xf32>
    %11 = vector.shape_cast %10 : vector<1x1x128xf32> to vector<128xf32>
    %c2_15 = arith.constant 2 : index
    %c0_16 = arith.constant 0 : index
    %c0_17 = arith.constant 0 : index
    %12 = vector.load %arg3[%c2_15, %c0_16, %c0_17] : memref<3x3x128xf32, #tpu.memory_space<vmem>>, vector<1x1x128xf32>
    %13 = vector.shape_cast %12 : vector<1x1x128xf32> to vector<128xf32>
    %c2_18 = arith.constant 2 : index
    %c1_19 = arith.constant 1 : index
    %c0_20 = arith.constant 0 : index
    %14 = vector.load %arg3[%c2_18, %c1_19, %c0_20] : memref<3x3x128xf32, #tpu.memory_space<vmem>>, vector<1x1x128xf32>
    %15 = vector.shape_cast %14 : vector<1x1x128xf32> to vector<128xf32>
    %c2_21 = arith.constant 2 : index
    %c2_22 = arith.constant 2 : index
    %c0_23 = arith.constant 0 : index
    %16 = vector.load %arg3[%c2_21, %c2_22, %c0_23] : memref<3x3x128xf32, #tpu.memory_space<vmem>>, vector<1x1x128xf32>
    %17 = vector.shape_cast %16 : vector<1x1x128xf32> to vector<128xf32>
    %c0_24 = arith.constant 0 : index
    %c0_25 = arith.constant 0 : index
    %18 = vector.load %arg4[%c0_24, %c0_25] : memref<1x128xf32, #tpu.memory_space<vmem>>, vector<1x128xf32>
    %19 = tpu.iota {dimensions = array<i32: 0>} : vector<288x1xi32>
    %c16_i32 = arith.constant 16 : i32
    %c0_i32 = arith.constant 0 : i32
    %20 = arith.cmpi eq, %c16_i32, %c0_i32 : i32
    %c1_i32 = arith.constant 1 : i32
    %21 = arith.select %20, %c1_i32, %c16_i32 : i32
    %22 = vector.broadcast %21 : i32 to vector<288x1xi32>
    %23 = arith.remsi %19, %22 : vector<288x1xi32>
    %c0_i32_26 = arith.constant 0 : i32
    %24 = vector.broadcast %c0_i32_26 : i32 to vector<288x1xi32>
    %25 = arith.cmpi ne, %23, %24 : vector<288x1xi32>
    %c0_i32_27 = arith.constant 0 : i32
    %26 = vector.broadcast %c0_i32_27 : i32 to vector<288x1xi32>
    %27 = arith.cmpi slt, %23, %26 : vector<288x1xi32>
    %c0_i32_28 = arith.constant 0 : i32
    %28 = arith.cmpi slt, %21, %c0_i32_28 : i32
    %29 = vector.broadcast %28 : i1 to vector<288x1xi1>
    %30 = vector.broadcast %29 : vector<288x1xi1> to vector<288x1xi1>
    %31 = arith.xori %27, %30 : vector<288x1xi1>
    %32 = arith.andi %31, %25 : vector<288x1xi1>
    %33 = vector.broadcast %21 : i32 to vector<288x1xi32>
    %34 = arith.addi %23, %33 : vector<288x1xi32>
    %35 = arith.select %32, %34, %23 : vector<288x1xi1>, vector<288x1xi32>
    %c1_i32_29 = arith.constant 1 : i32
    %36 = vector.broadcast %c1_i32_29 : i32 to vector<288x1xi32>
    %37 = arith.cmpi sge, %35, %36 : vector<288x1xi32>
    %c14_i32 = arith.constant 14 : i32
    %38 = vector.broadcast %c14_i32 : i32 to vector<288x1xi32>
    %39 = arith.cmpi sle, %35, %38 : vector<288x1xi32>
    %cst = arith.constant 0.000000e+00 : f32
    %40 = vector.broadcast %cst : f32 to vector<16x128xf32>
    %c0_30 = arith.constant 0 : index
    %c0_31 = arith.constant 0 : index
    %c0_32 = arith.constant 0 : index
    %41 = vector.load %arg2[%c0_30, %c0_31, %c0_32] : memref<1x256x128xf32, #tpu.memory_space<vmem>>, vector<1x256x128xf32>
    %42 = vector.shape_cast %41 : vector<1x256x128xf32> to vector<256x128xf32>
    %c-16_i32 = arith.constant -16 : i32
    %c0_i32_33 = arith.constant 0 : i32
    %43 = arith.maxsi %c-16_i32, %c0_i32_33 : i32
    %c0_34 = arith.constant 0 : index
    %44 = arith.index_cast %43 : i32 to index
    %c0_35 = arith.constant 0 : index
    %45 = vector.load %arg2[%c0_34, %44, %c0_35] : memref<1x256x128xf32, #tpu.memory_space<vmem>>, vector<1x16x128xf32>
    %46 = vector.shape_cast %45 : vector<1x16x128xf32> to vector<16x128xf32>
    %false = arith.constant false
    %47 = arith.select %false, %46, %40 : vector<16x128xf32>
    %c256_i32 = arith.constant 256 : i32
    %c240_i32 = arith.constant 240 : i32
    %48 = arith.minsi %c256_i32, %c240_i32 : i32
    %c0_36 = arith.constant 0 : index
    %49 = arith.index_cast %48 : i32 to index
    %c0_37 = arith.constant 0 : index
    %50 = vector.load %arg2[%c0_36, %49, %c0_37] : memref<1x256x128xf32, #tpu.memory_space<vmem>>, vector<1x16x128xf32>
    %51 = vector.shape_cast %50 : vector<1x16x128xf32> to vector<16x128xf32>
    %false_38 = arith.constant false
    %52 = arith.select %false_38, %51, %40 : vector<16x128xf32>
    %53 = tpu.concatenate %47, %42, %52 in 0 : vector<16x128xf32>, vector<256x128xf32>, vector<16x128xf32> -> vector<288x128xf32>
    %c1_i32_39 = arith.constant 1 : i32
    %54 = tpu.dynamic_rotate %53 by %c1_i32_39 dim 0 : vector<288x128xf32>, i32 -> vector<288x128xf32>
    %c0_i32_40 = arith.constant 0 : i32
    %55 = arith.sitofp %c0_i32_40 : i32 to f32
    %56 = vector.shape_cast %37 : vector<288x1xi1> to vector<288x1xi1>
    %57 = vector.broadcast %56 : vector<288x1xi1> to vector<288x128xi1>
    %58 = vector.broadcast %55 : f32 to vector<288x128xf32>
    %59 = arith.select %57, %54, %58 : vector<288x128xi1>, vector<288x128xf32>
    %c287_i32 = arith.constant 287 : i32
    %60 = tpu.dynamic_rotate %53 by %c287_i32 dim 0 : vector<288x128xf32>, i32 -> vector<288x128xf32>
    %c0_i32_41 = arith.constant 0 : i32
    %61 = arith.sitofp %c0_i32_41 : i32 to f32
    %62 = vector.shape_cast %39 : vector<288x1xi1> to vector<288x1xi1>
    %63 = vector.broadcast %62 : vector<288x1xi1> to vector<288x128xi1>
    %64 = vector.broadcast %61 : f32 to vector<288x128xf32>
    %65 = arith.select %63, %60, %64 : vector<288x128xi1>, vector<288x128xf32>
    %66 = vector.shape_cast %3 : vector<128xf32> to vector<1x128xf32>
    %67 = vector.broadcast %66 : vector<1x128xf32> to vector<288x128xf32>
    %68 = arith.mulf %53, %67 : vector<288x128xf32>
    %69 = vector.shape_cast %1 : vector<128xf32> to vector<1x128xf32>
    %70 = vector.broadcast %69 : vector<1x128xf32> to vector<288x128xf32>
    %71 = arith.mulf %59, %70 : vector<288x128xf32>
    %72 = arith.addf %68, %71 : vector<288x128xf32>
    %73 = vector.shape_cast %5 : vector<128xf32> to vector<1x128xf32>
    %74 = vector.broadcast %73 : vector<1x128xf32> to vector<288x128xf32>
    %75 = arith.mulf %65, %74 : vector<288x128xf32>
    %76 = arith.addf %72, %75 : vector<288x128xf32>
    %77 = vector.shape_cast %9 : vector<128xf32> to vector<1x128xf32>
    %78 = vector.broadcast %77 : vector<1x128xf32> to vector<288x128xf32>
    %79 = arith.mulf %53, %78 : vector<288x128xf32>
    %80 = vector.shape_cast %7 : vector<128xf32> to vector<1x128xf32>
    %81 = vector.broadcast %80 : vector<1x128xf32> to vector<288x128xf32>
    %82 = arith.mulf %59, %81 : vector<288x128xf32>
    %83 = arith.addf %79, %82 : vector<288x128xf32>
    %84 = vector.shape_cast %11 : vector<128xf32> to vector<1x128xf32>
    %85 = vector.broadcast %84 : vector<1x128xf32> to vector<288x128xf32>
    %86 = arith.mulf %65, %85 : vector<288x128xf32>
    %87 = arith.addf %83, %86 : vector<288x128xf32>
    %88 = vector.shape_cast %15 : vector<128xf32> to vector<1x128xf32>
    %89 = vector.broadcast %88 : vector<1x128xf32> to vector<288x128xf32>
    %90 = arith.mulf %53, %89 : vector<288x128xf32>
    %91 = vector.shape_cast %13 : vector<128xf32> to vector<1x128xf32>
    %92 = vector.broadcast %91 : vector<1x128xf32> to vector<288x128xf32>
    %93 = arith.mulf %59, %92 : vector<288x128xf32>
    %94 = arith.addf %90, %93 : vector<288x128xf32>
    %95 = vector.shape_cast %17 : vector<128xf32> to vector<1x128xf32>
    %96 = vector.broadcast %95 : vector<1x128xf32> to vector<288x128xf32>
    %97 = arith.mulf %65, %96 : vector<288x128xf32>
    %98 = arith.addf %94, %97 : vector<288x128xf32>
    %99 = vector.extract_strided_slice %76 {offsets = [0, 0], sizes = [256, 128], strides = [1, 1]} : vector<288x128xf32> to vector<256x128xf32>
    %100 = vector.extract_strided_slice %87 {offsets = [16, 0], sizes = [256, 128], strides = [1, 1]} : vector<288x128xf32> to vector<256x128xf32>
    %101 = arith.addf %99, %100 : vector<256x128xf32>
    %102 = vector.extract_strided_slice %98 {offsets = [32, 0], sizes = [256, 128], strides = [1, 1]} : vector<288x128xf32> to vector<256x128xf32>
    %103 = arith.addf %101, %102 : vector<256x128xf32>
    %104 = vector.broadcast %18 : vector<1x128xf32> to vector<256x128xf32>
    %105 = arith.addf %103, %104 : vector<256x128xf32>
    %c0_42 = arith.constant 0 : index
    %c0_43 = arith.constant 0 : index
    %c0_44 = arith.constant 0 : index
    %106 = vector.load %arg5[%c0_42, %c0_43, %c0_44] : memref<1x256x128xf32, #tpu.memory_space<vmem>>, vector<1x256x128xf32>
    %107 = vector.shape_cast %106 : vector<1x256x128xf32> to vector<256x128xf32>
    %108 = vector.shape_cast %105 : vector<256x128xf32> to vector<1x256x128xf32>
    tpu.vector_store %arg5[%c0_42, %c0_43, %c0_44], %108 {strides = array<i32>} : memref<1x256x128xf32, #tpu.memory_space<vmem>>, vector<1x256x128xf32>,
    return
  }
  func.func @transform_0(%arg0: i32, %arg1: i32) -> (i32, i32, i32) {
    %c0_i32 = arith.constant 0 : i32
    %c0_i32_0 = arith.constant 0 : i32
    return %arg1, %c0_i32, %arg0 : i32, i32, i32
  }
  func.func @transform_1(%arg0: i32, %arg1: i32) -> (i32, i32, i32) {
    %c0_i32 = arith.constant 0 : i32
    %c0_i32_0 = arith.constant 0 : i32
    %c0_i32_1 = arith.constant 0 : i32
    return %c0_i32, %c0_i32_0, %arg0 : i32, i32, i32
  }
  func.func @transform_2(%arg0: i32, %arg1: i32) -> (i32, i32) {
    %c0_i32 = arith.constant 0 : i32
    %c0_i32_0 = arith.constant 0 : i32
    return %c0_i32, %arg0 : i32, i32
  }
  func.func @transform_3(%arg0: i32, %arg1: i32) -> (i32, i32, i32) {
    %c0_i32 = arith.constant 0 : i32
    %c0_i32_0 = arith.constant 0 : i32
    return %arg1, %c0_i32, %arg0 : i32, i32, i32
  }
}

</mosaic_0001>

<bundles_post_ra>
// kernel: tpu_custom_call.1
= control target key start
LH: loop header
LB: loop body
LE: loop exit
PB: predicated region body
PF: predicated region fallthrough
CT: control target
= control target key end

     0   :  { %8 = vsyncpa [#allocation3], 0  ;;  %s3596_s0 = inlined_call_operand.hbm [shape: f32[2,256,128], index: 0, kind: input, shape index: {}]   ;;  %s3597_s1 = inlined_call_operand.hbm [shape: f32[3,3,128], index: 1, kind: input, shape index: {}]   ;;  %s3598_s2 = inlined_call_operand.vmem [shape: f32[1,128], index: 2, kind: input, shape index: {}]   ;;  %s3599_s3 = inlined_call_operand.hbm [shape: f32[2,256,128], index: 3, kind: output, shape index: {}]  }
   0x1   :  { %10 = vsyncpa [#allocation3 + $0x1], 0 }
   0x2   :  { %11 = vsyncpa [#allocation6], 0 }
   0x3   :  { %12 = vsyncpa [#allocation4], 0 }
   0x4   :  { %14 = vsyncpa [#allocation4 + $0x1], 0  ;;  %s2241_s12 = smov 0   ;;  %s2243_s13 = smov 0  }
   0x5   :  { %s2245_s14 = smov 0   ;;  %s2247_s15 = smov 0  }
   0x6   :  { %s2249_s16 = smov 0   ;;  %s2251_s17 = smov 0  }
   0x7 LB: > { %s1947_s18 = sadd.s32 4294967295, %s2210_s17   ;;  %s1948_s19 = sadd.s32 4294967294, %s2210_s17   ;;  %s2210_s17 = sphi %s2251_s17, %s20_s17   ;;  %s2206_s16 = sphi %s2249_s16, %s3629_s16   ;;  %s2202_s15 = sphi %s2247_s15, %s3628_s15   ;;  %s2198_s14 = sphi %s2245_s14, %s3627_s14   ;;  %s2194_s13 = sphi %s2243_s13, %s3626_s13   ;;  %s2190_s12 = sphi %s2241_s12, %s3625_s12  }
   0x8   : > { %p54_p0 = scmp.ne.s32.totalorder %s2194_s13, %s2190_s12  ;;  %p2275_p1 = scmp.eq.s32.totalorder %s1947_s18, 0 }
   0x9   : > { %p2279_p2 = scmp.eq.s32.totalorder %s1947_s18, 1  ;;  %p138_p3 = scmp.eq.s32.totalorder %s1948_s19, 1 }
   0xa   : > { %s3604_s20 = scalar_select %p2275_p1, 1, 0 }
   0xb   : > { %s3605_s21 = scalar_select %p2279_p2, 1, 0 }
   0xc   : > { %p2285_p4 = por %p2275_p1, %p54_p0  ;;  %p1949_p5 = scmp.ge.s32.totalorder %s2210_s17, 1 }
   0xd   : > { %p2290_p6 = por %p138_p3, %p54_p0  ;;  %p145_p7 = scmp.lt.s32.totalorder %s2210_s17, 3 }
   0xe   : > { %s3606_s22 = scalar_select %p2285_p4, 1, 0 }
   0xf   : > { %s3607_s23 = scalar_select %p2290_p6, 1, 0 }
  0x10   : > { %p2295_p8 = pnand %p1949_p5, %p145_p7  ;;  %s2212_s25 = smov [#allocation5]  }
  0x11   : > { %s159_s26 = sshll.u32 %s2212_s25, 4  ;;  %s29_s28 = sadd.s32 1, %s2206_s16  ;;  %s160_s26 = int_to_ptr.vmem [resolvable:$true] %s159_s26 }
  0x12   : > { %s3608_s24 = scalar_select %p2295_p8, 1, 0 }
  0x13   : > { %p1985_p9 = pneg %p2295_p8  ;;  %s2066_s4 = scalar_lea.hbm %s3597_s1, 192 }
  0x14   : > { %p2067_p12 = scmp.ne.s32.totalorder %s3597_s1, %s2066_s4  ;;  %p2073_p5 = scmp.lt.u32.totalorder %s2066_s4, %s3597_s1 }
  0x15   : > { %p2304_p11 = pnand %p1985_p9, %p2275_p1 }
  0x17   : > { %p2068_p13 = pneg %p2304_p11 }
  0x19   : > { %p2069_p0 = pnand %p2068_p13, %p2067_p12 }
  0x1b   : > { %p2070_p3 = pneg %p2069_p0 }
  0x1d   : > { %p2075_p7 = pnand %p2073_p5, %p2070_p3 }
  0x1f   : > { %2078 = shalt.err (!%p2075_p7)
}
  0x20   : > { %s2079_s9 = scalar_lea.vmem %s160_s26, 192  ;;  %p2087_p1 = scmp.lt.s32.totalorder %s160_s26, %s160_s26 }
  0x21   : > { %p2080_p9 = scmp.ne.s32.totalorder %s160_s26, %s2079_s9  ;;  %p2088_p4 = scmp.lt.s32.totalorder %s2079_s9, %s2079_s9 }
  0x23   : > { %p2082_p10 = pnand %p2080_p9, %p2068_p13  ;;  %p2089_p8 = por %p2088_p4, %p2087_p1 }
  0x25   : > { %p2083_p6 = pneg %p2082_p10 }
  0x27   : > { %p2090_p2 = pnand %p2089_p8, %p2083_p6 }
  0x29   : > { %2093 = shalt.err (!%p2090_p2)
}
  0x2a   : > { %s2213_s10 = smov 64   ;;  %s2214_s11 = smov 4  }
  0x2b   : > { %1988 = dma.hbm_to_vmem [thread:$0]  (!%p2304_p11), %s3597_s1, 192, %s160_s26, [#allocation6], %s2213_s10, %s2213_s10, %s2214_s11  }
  0x2c   : > { %p30_p1 = scmp.ge.s32.totalorder %s29_s28, 2  ;;  %s41_s25 = sadd.s32 1, %s2198_s14 }
  0x2d   : > { %p48_p2 = scmp.ne.s32.totalorder %s2198_s14, %s2194_s13  ;;  %p49_p4 = scmp.eq.s32.totalorder %s2210_s17, 0 }
  0x2e   : > { %s3631_s28 = smov (%p30_p1, %s29_s28), 0  ;;  %p3611_p8 = scmp.ne.s32.totalorder %s3605_s21, 0 }
  0x2f   : > { %p2331_p6 = por %p49_p4, %p48_p2  ;;  %s36_s27 = ssub.s32 %s2206_s16, %s3631_s28 }
  0x30   : > { %p2337_p10 = por %p3611_p8, %p48_p2  ;;  %p1998_p12 = scmp.lt.s32.totalorder %s2210_s17, 2 }
  0x31   : > { %p39_p11 = scmp.eq.s32.totalorder %s36_s27, 0  ;;  %s179_s26 = sand.u32 1, %s2198_s14  }
  0x32   : > { %s1953_s4 = sshll.u32 %s179_s26, 8  ;;  %s1975_s6 = sshll.u32 %s2206_s16, 12 }
  0x33   : > { %s2346_s5 = scalar_select %p39_p11, %s2198_s14, %s41_s25  }
  0x34   : > { %s2352_s9 = scalar_lea.hbm %s3596_s0, %s1975_s6  ;;  %s183_s21 = scalar_lea.vmem [#allocation2], %s1953_s4 }
  0x35   : > { %s191_s10 = sshll.u32 %s183_s21, 4  ;;  %p2358_p13 = pnand %p1998_p12, %p2331_p6  ;;  %s2354_s10 = int_to_ptr.vmem [resolvable:$true] %s191_s10 }
  0x36   : > { %s2362_s18 = scalar_lea.sflag [#allocation3], %s179_s26  ;;  %s2094_s19 = scalar_lea.hbm %s2352_s9, 4096 }
  0x37   : > { %p2095_p0 = scmp.ne.s32.totalorder %s2352_s9, %s2094_s19  ;;  %p2096_p3 = pneg %p2358_p13 }
  0x38   : > { %s2099_s29 = scalar_lea.hbm %s3596_s0, 8192  ;;  %p2100_p9 = scmp.lt.u32.totalorder %s2352_s9, %s3596_s0 }
  0x39   : > { %p2097_p5 = pnand %p2096_p3, %p2095_p0  ;;  %p2101_p1 = scmp.lt.u32.totalorder %s2099_s29, %s2094_s19 }
  0x3a   : > { %p2103_p4 = scmp.lt.u32.totalorder %s2094_s19, %s2352_s9 }
  0x3b   : > { %p2098_p7 = pneg %p2097_p5  ;;  %p2102_p2 = por %p2101_p1, %p2100_p9 }
  0x3d   : > { %p2104_p6 = por %p2103_p4, %p2102_p2 }
  0x3f   : > { %p2105_p8 = pnand %p2104_p6, %p2098_p7 }
  0x41   : > { %2108 = shalt.err (!%p2105_p8)
}
  0x42   : > { %s2109_s26 = scalar_lea.vmem %s2354_s10, 4096  ;;  %s2215_s7 = smov [#allocation2]  }
  0x43   : > { %p2110_p12 = scmp.ne.s32.totalorder %s2354_s10, %s2109_s26  ;;  %s2114_s8 = sshll.u32 %s2215_s7, 4  ;;  %s2115_s8 = int_to_ptr.vmem [resolvable:$false] %s2114_s8 }
  0x44   : > { %s2116_s21 = scalar_lea.vmem %s2115_s8, 8192  ;;  %p2117_p5 = scmp.lt.s32.totalorder %s2354_s10, %s2115_s8 }
  0x45   : > { %p2112_p11 = pnand %p2110_p12, %p2096_p3  ;;  %p2118_p9 = scmp.lt.s32.totalorder %s2116_s21, %s2109_s26 }
  0x47   : > { %p2113_p0 = pneg %p2112_p11  ;;  %p2119_p1 = por %p2118_p9, %p2117_p5 }
  0x49   : > { %p2120_p2 = pnand %p2119_p1, %p2113_p0 }
  0x4b   : > { %2123 = shalt.err (!%p2120_p2)
}
  0x4c   : > { %s2216_s19 = smov 128   ;;  %s2217_s25 = smov 8  }
  0x4d   : > { %1992 = dma.hbm_to_vmem [thread:$0]  (!%p2358_p13), %s2352_s9, 4096, %s2354_s10, %s2362_s18, %s2216_s19, %s2216_s19, %s2217_s25  }
  0x4e   : > { %p3614_p3 = scmp.ne.s32.totalorder %s3608_s24, 0 }
  0x4f   : > { %s2393_s27 = sand.u32 (!%p3614_p3), 1, %s2194_s13   ;;  %p3615_p7 = scmp.ne.s32.totalorder (!%p3614_p3), %s3606_s22, 0 }
  0x50   : > { %203 = sbr.rel (%p3614_p3) target bundleno = 326 (0x146), region = 32  ;;  %s1957_s29 = sshll.u32 (!%p3614_p3), %s2393_s27, 8 }
  0x51   : > { %s206_s4 = scalar_lea.sflag (!%p3614_p3), [#allocation3], %s2393_s27  ;;  %s2399_s6 = scalar_lea.vmem (!%p3614_p3), [#allocation2], %s1957_s29 }
  0x57   : > { %2177 = dma.done.wait (%p3615_p7), %s206_s4, 4096  }
  0x58   : > { %2179 = vsyncadd (%p3615_p7), %s206_s4, 4294963200  ;;  %p3616_p13 = scmp.ne.s32.totalorder %s3604_s20, 0 }
  0x5a   : > { %2181 = dma.done.wait (%p3616_p13), [#allocation6], 192  }
  0x5b   : > { %2183 = vsyncadd (%p3616_p13), [#allocation6], 4294967104  ;;  %v254_v0 = vlaneseq  ;;  %v2417_v8 = vld [vmem:[#allocation5] ss:$0 sm:$0xff]  ;;  %v2429_v13 = vld [vmem:[#allocation5 + $0x1] ss:$0 sm:$0xff] }
  0x5c   : > { %v2431_v14 = vld [vmem:[#allocation5 + $0x2] ss:$0 sm:$0xff]  ;;  %v2433_v15 = vld [vmem:[#allocation5 + $0x5] ss:$0 sm:$0xff]  ;;  %v2435_v16 = vld [vmem:[#allocation5 + $0x4] ss:$0 sm:$0xff] }
  0x5d   : > { %v2409_v1 = vshrl.u32 %v254_v0, 7  ;;  %v2437_v17 = vld [vmem:[#allocation5 + $0x6] ss:$0 sm:$0xff]  ;;  %v2451_v21 = vld [vmem:[%s2399_s6 + $0x8] sm:$0xff]  ;;  %v2456_v23 = vld [vmem:[%s2399_s6 + $0x10] sm:$0xff]  ;;  %v1179_v33 = vmul.f32 0.0, %v2429_v13 }
  0x5e   : > { %v2448_v20 = vld [vmem:[%s2399_s6] sm:$0xff]  ;;  %v2453_v22 = vld [vmem:[#allocation5 + $0x8] ss:$0 sm:$0xff]  ;;  %v2459_v24 = vld [vmem:[%s2399_s6 + $0x18] sm:$0xff]  ;;  %v828_v26 = vrot.slane %v2451_v21, 7  ;;  %v1002_v28 = vrot.slane %v2451_v21, 1  ;;  %v1351_v19 = vmul.f32 %v2433_v15, %v2451_v21 }
  0x5f   : > { %v257_v2 = vadd.s32 16, %v2409_v1  ;;  %v259_v3 = vadd.s32 32, %v2409_v1  ;;  %vm859_vm0 = vcmp.lt.s32.totalorder %v2409_v1, 1  ;;  %vm1033_vm1 = vcmp.lt.s32.totalorder %v2409_v1, 7  ;;  %v2465_v29 = vld [vmem:[#allocation5 + $0x9] ss:$0 sm:$0xff] }
  0x60   : > { %v256_v6 = vadd.s32 8, %v2409_v1  ;;  %v258_v7 = vadd.s32 24, %v2409_v1  ;;  %v260_v9 = vadd.s32 40, %v2409_v1  ;;  %v2421_v10 = vadd.s32 48, %v2409_v1  ;;  %v2471_v34 = vld [vmem:[#allocation5 + $0xa] ss:$0 sm:$0xff] }
  0x61   : > { %v309_v4 = vand.u32 15, %v257_v2  ;;  %v323_v5 = vand.u32 15, %v259_v3  ;;  %v2424_v11 = vadd.s32 56, %v2409_v1  ;;  %v2427_v12 = vadd.s32 64, %v2409_v1  ;;  %v2509_v57 = vld [vmem:[%s2399_s6 + $0x20] sm:$0xff]  ;;  %s2557_s24 = scalar_lea.vmem [#allocation7], %s1957_s29 }
  0x62   : > { %v827_v25 = vrot.slane %v2448_v20, 7  ;;  %v1001_v27 = vrot.slane %v2448_v20, 1  ;;  %v829_v30 = vrot.slane %v2456_v23, 7  ;;  %v1003_v31 = vrot.slane %v2456_v23, 1  ;;  %s1976_s11 = sshll.u32 %s2202_s15, 12  ;;  %s1838_s18 = sshll.u32 %s2557_s24, 4  ;;  %s3545_s18 = int_to_ptr.vmem [resolvable:$true] %s1838_s18 }
  0x63   : > { %vm2439_vm2 = vcmp.ge.s32.totalorder %v309_v4, 1  ;;  %vm2443_vm3 = vcmp.ge.s32.totalorder %v323_v5, 1  ;;  %v1004_v32 = vrot.slane %v2459_v24, 1  ;;  %v1214_v37 = vmul.f32 0.0, %v2417_v8  ;;  %s3543_s8 = scalar_lea.hbm %s3599_s3, %s1976_s11  ;;  %s1824_s21 = scalar_lea.sflag [#allocation4], %s2393_s27 }
  0x64   : > { %v892_v35 = vsel %vm859_vm0, 0.0, %v827_v25  ;;  %v2477_v36 = vsel %vm1033_vm1, %v1001_v27, %v1002_v28  ;;  %v1282_v38 = vmul.f32 0.0, %v2431_v14  ;;  %v890_v39 = vsel %vm859_vm0, %v828_v26, %v829_v30  ;;  %s2124_s15 = scalar_lea.vmem %s3545_s18, 4096  ;;  %s2218_s19 = smov [#allocation7]  }
  0x65   : > { %v967_v40 = vsel %vm2439_vm2, %v892_v35, 0.0  ;;  %v2487_v41 = vsel %vm1033_vm1, %v1003_v31, %v1004_v32  ;;  %v1350_v42 = vmul.f32 %v2433_v15, %v2448_v20  ;;  %v2493_v43 = vsel %vm2443_vm3, %v890_v39, 0.0  ;;  %p2125_p4 = scmp.ne.s32.totalorder %s3545_s18, %s2124_s15  ;;  %s2128_s25 = sshll.u32 %s2218_s19, 4  ;;  %s2129_s25 = int_to_ptr.vmem [resolvable:$false] %s2128_s25 }
  0x66   : > { %v1246_v44 = vadd.f32 %v1214_v37, %v1179_v33  ;;  %v1386_v45 = vmul.f32 %v2435_v16, %v967_v40  ;;  %v1454_v46 = vmul.f32 %v2437_v17, %v2477_v36  ;;  %v1522_v47 = vmul.f32 %v2465_v29, %v2456_v23  ;;  %v2547_v37 = vld [vmem:[%s2399_s6 + $0x28] sm:$0xff]  ;;  %s2130_s29 = scalar_lea.vmem %s2129_s25, 8192  ;;  %p2131_p12 = scmp.lt.s32.totalorder %s3545_s18, %s2129_s25 }
  0x67   : > { %v1557_v48 = vmul.f32 %v2453_v22, %v2493_v43  ;;  %v1625_v49 = vmul.f32 %v2471_v34, %v2487_v41  ;;  %v302_v50 = vand.u32 15, %v256_v6  ;;  %v316_v53 = vand.u32 15, %v258_v7  ;;  %v2530_v7 = vld [vmem:[%s3598_s2] ss:$0 sm:$0xff]  ;;  %p2126_p6 = pnand %p2125_p4, %p2337_p10  ;;  %p2132_p11 = scmp.lt.s32.totalorder %s2130_s29, %s2124_s15 }
  0x68   : > { %v1314_v51 = vadd.f32 %v1282_v38, %v1246_v44  ;;  %v1418_v52 = vadd.f32 %v1386_v45, %v1350_v42  ;;  %v330_v54 = vand.u32 15, %v260_v9  ;;  %v830_v58 = vrot.slane %v2459_v24, 7 }
  0x69   : > { %v1589_v55 = vadd.f32 %v1557_v48, %v1522_v47  ;;  %vm2504_vm4 = vcmp.le.s32.totalorder %v302_v50, 14  ;;  %v891_v59 = vsel %vm859_vm0, %v827_v25, %v828_v26  ;;  %vm762_vm5 = vcmp.le.s32.totalorder %v316_v53, 14  ;;  %p2127_p8 = pneg %p2126_p6  ;;  %p2133_p0 = por %p2132_p11, %p2131_p12 }
  0x6a   : > { %v1486_v60 = vadd.f32 %v1454_v46, %v1418_v52  ;;  %vm764_vm6 = vcmp.le.s32.totalorder %v330_v54, 14  ;;  %v1005_v61 = vrot.slane %v2509_v57, 1  ;;  %v2517_v63 = vsel %vm859_vm0, %v829_v30, %v830_v58 }
  0x6b   : > { %v1657_v62 = vadd.f32 %v1625_v49, %v1589_v55  ;;  %v1064_v0 = vsel %vm1033_vm1, %v1002_v28, %v1003_v31  ;;  %v1066_v2 = vsel %vm1033_vm1, 0.0, %v1001_v27  ;;  %v1387_v25 = vmul.f32 %v2435_v16, %v891_v59  ;;  %p2134_p5 = pnand %p2133_p0, %p2127_p8 }
  0x6c   : > { %v1689_v3 = vadd.f32 %v1486_v60, %v1314_v51  ;;  %v1062_v4 = vsel %vm1033_vm1, %v1004_v32, %v1005_v61  ;;  %v1140_v5 = vsel %vm2504_vm4, %v1066_v2, 0.0  ;;  %v1142_v6 = vsel %vm762_vm5, %v1064_v0, 0.0 }
  0x6d   : > { %v2532_v9 = vsel %vm764_vm6, %v1062_v4, 0.0  ;;  %v1283_v18 = vmul.f32 %v2431_v14, %v1140_v5  ;;  %v1455_v27 = vmul.f32 %v2437_v17, %v1142_v6  ;;  %v1523_v28 = vmul.f32 %v2465_v29, %v2459_v24 }
  0x6e   : > { %v1721_v26 = vadd.f32 %v1689_v3, %v1657_v62  ;;  %v1558_v30 = vmul.f32 %v2453_v22, %v2517_v63  ;;  %v1419_v32 = vadd.f32 %v1387_v25, %v1351_v19  ;;  %v1626_v33 = vmul.f32 %v2471_v34, %v2532_v9  ;;  %v2584_v62 = vld [vmem:[%s2399_s6 + $0x30] sm:$0xff] }
  0x6f   : > { %v1315_v31 = vadd.f32 %v1283_v18, %v1246_v44  ;;  %v337_v35 = vand.u32 15, %v2421_v10  ;;  %v831_v42 = vrot.slane %v2509_v57, 7  ;;  %v1006_v45 = vrot.slane %v2547_v37, 1 }
  0x70   : > { %v1759_v38 = vadd.f32 %v2530_v7, %v1721_v26  ;;  %v1590_v39 = vadd.f32 %v1558_v30, %v1523_v28  ;;  %v1487_v46 = vadd.f32 %v1455_v27, %v1419_v32  ;;  %v1180_v44 = vmul.f32 %v2429_v13, %v2448_v20 }
  0x71   : > { %vm729_vm7 = vcmp.ge.s32.totalorder %v337_v35, 1  ;;  %v1216_v47 = vmul.f32 %v2417_v8, %v967_v40  ;;  %v888_v48 = vsel %vm859_vm0, %v830_v58, %v831_v42  ;;  %v2564_v49 = vsel %vm1033_vm1, %v1005_v61, %v1006_v45 }
  0x72   : > { %1791 = vst [vmem:[%s2557_s24] sm:$0xff] %v1759_v38  ;;  %v1658_v10 = vadd.f32 %v1626_v33, %v1590_v39  ;;  %v1284_v50 = vmul.f32 %v2431_v14, %v2477_v36  ;;  %v1690_v20 = vadd.f32 %v1487_v46, %v1315_v31  ;;  %v2568_v51 = vsel %vm729_vm7, %v888_v48, 0.0 }
  0x73   : > { %v1248_v40 = vadd.f32 %v1216_v47, %v1180_v44  ;;  %v1352_v52 = vmul.f32 %v2433_v15, %v2456_v23  ;;  %v1388_v53 = vmul.f32 %v2435_v16, %v2493_v43  ;;  %v1456_v54 = vmul.f32 %v2437_v17, %v2487_v41 }
  0x74   : > { %v1524_v55 = vmul.f32 %v2465_v29, %v2509_v57  ;;  %v1559_v56 = vmul.f32 %v2453_v22, %v2568_v51  ;;  %v1722_v36 = vadd.f32 %v1690_v20, %v1658_v10  ;;  %v1627_v60 = vmul.f32 %v2471_v34, %v2564_v49 }
  0x75   : > { %v1316_v58 = vadd.f32 %v1284_v50, %v1248_v40  ;;  %v344_v61 = vand.u32 15, %v2424_v11  ;;  %v1420_v0 = vadd.f32 %v1388_v53, %v1352_v52  ;;  %v832_v3 = vrot.slane %v2547_v37, 7 }
  0x76   : > { %v1591_v2 = vadd.f32 %v1559_v56, %v1524_v55  ;;  %v1007_v4 = vrot.slane %v2584_v62, 1  ;;  %v1760_v5 = vadd.f32 %v2530_v7, %v1722_v36  ;;  %v1181_v18 = vmul.f32 %v2429_v13, %v2451_v21 }
  0x77   : > { %vm766_vm8 = vcmp.le.s32.totalorder %v344_v61, 14  ;;  %v1217_v19 = vmul.f32 %v2417_v8, %v891_v59  ;;  %v1488_v25 = vadd.f32 %v1456_v54, %v1420_v0  ;;  %v2594_v11 = vsel %vm859_vm0, %v831_v42, %v832_v3 }
  0x78   : > { %v1659_v26 = vadd.f32 %v1627_v60, %v1591_v2  ;;  %v1060_v27 = vsel %vm1033_vm1, %v1006_v45, %v1007_v4  ;;  %1792 = vst [vmem:[%s2557_s24 + $0x8] sm:$0xff] %v1760_v5  ;;  %v1285_v31 = vmul.f32 %v2431_v14, %v1142_v6  ;;  %v1353_v21 = vmul.f32 %v2433_v15, %v2459_v24  ;;  %v2616_v45 = vld [vmem:[%s2399_s6 + $0x38] sm:$0xff] }
  0x79   : > { %v2599_v28 = vsel %vm766_vm8, %v1060_v27, 0.0  ;;  %v1249_v30 = vadd.f32 %v1217_v19, %v1181_v18  ;;  %v1691_v59 = vadd.f32 %v1488_v25, %v1316_v58  ;;  %v1389_v32 = vmul.f32 %v2435_v16, %v2517_v63  ;;  %v2650_v18 = vld [vmem:[%s2399_s6 + $0x40] sm:$0xff] }
  0x7a   : > { %v1457_v33 = vmul.f32 %v2437_v17, %v2532_v9  ;;  %v1525_v35 = vmul.f32 %v2465_v29, %v2547_v37  ;;  %v1560_v39 = vmul.f32 %v2453_v22, %v2594_v11  ;;  %v1628_v6 = vmul.f32 %v2471_v34, %v2599_v28 }
  0x7b   : > { %v1317_v38 = vadd.f32 %v1285_v31, %v1249_v30  ;;  %v351_v42 = vand.u32 15, %v2427_v12  ;;  %v1723_v46 = vadd.f32 %v1691_v59, %v1659_v26  ;;  %v1421_v44 = vadd.f32 %v1389_v32, %v1353_v21 }
  0x7c   : > { %v833_v47 = vrot.slane %v2584_v62, 7  ;;  %v1008_v10 = vrot.slane %v2616_v45, 1  ;;  %v1592_v48 = vadd.f32 %v1560_v39, %v1525_v35  ;;  %v1182_v50 = vmul.f32 %v2429_v13, %v2456_v23 }
  0x7d   : > { %vm731_vm9 = vcmp.ge.s32.totalorder %v351_v42, 1  ;;  %v1218_v20 = vmul.f32 %v2417_v8, %v2493_v43  ;;  %v1761_v40 = vadd.f32 %v2530_v7, %v1723_v46  ;;  %v1489_v12 = vadd.f32 %v1457_v33, %v1421_v44 }
  0x7e   : > { %v886_v52 = vsel %vm859_vm0, %v832_v3, %v833_v47  ;;  %v2629_v53 = vsel %vm1033_vm1, %v1007_v4, %v1008_v10  ;;  %v1660_v54 = vadd.f32 %v1628_v6, %v1592_v48  ;;  %v1286_v23 = vmul.f32 %v2431_v14, %v2487_v41 }
  0x7f   : > { %v2631_v55 = vsel %vm731_vm9, %v886_v52, 0.0  ;;  %v1250_v56 = vadd.f32 %v1218_v20, %v1182_v50  ;;  %1793 = vst [vmem:[%s2557_s24 + $0x10] sm:$0xff] %v1761_v40  ;;  %v1692_v43 = vadd.f32 %v1489_v12, %v1317_v38  ;;  %v1354_v36 = vmul.f32 %v2433_v15, %v2509_v57  ;;  %v2683_v20 = vld [vmem:[%s2399_s6 + $0x48] sm:$0xff] }
  0x80   : > { %v1390_v58 = vmul.f32 %v2435_v16, %v2568_v51  ;;  %v1458_v60 = vmul.f32 %v2437_v17, %v2564_v49  ;;  %v1526_v0 = vmul.f32 %v2465_v29, %v2584_v62  ;;  %v1561_v2 = vmul.f32 %v2453_v22, %v2631_v55 }
  0x81   : > { %v1318_v61 = vadd.f32 %v1286_v23, %v1250_v56  ;;  %v1629_v41 = vmul.f32 %v2471_v34, %v2629_v53  ;;  %v1724_v3 = vadd.f32 %v1692_v43, %v1660_v54  ;;  %v264_v5 = vadd.s32 72, %v2409_v1 }
  0x82   : > { %v1422_v4 = vadd.f32 %v1390_v58, %v1354_v36  ;;  %v834_v19 = vrot.slane %v2616_v45, 7  ;;  %v1593_v25 = vadd.f32 %v1561_v2, %v1526_v0  ;;  %v1009_v26 = vrot.slane %v2650_v18, 1 }
  0x83   : > { %v1183_v27 = vmul.f32 %v2429_v13, %v2459_v24  ;;  %v1219_v30 = vmul.f32 %v2417_v8, %v2517_v63  ;;  %v1762_v31 = vadd.f32 %v2530_v7, %v1724_v3  ;;  %v358_v59 = vand.u32 15, %v264_v5 }
  0x84   : > { %v1490_v21 = vadd.f32 %v1458_v60, %v1422_v4  ;;  %v2661_v32 = vsel %vm859_vm0, %v833_v47, %v834_v19  ;;  %v1661_v33 = vadd.f32 %v1629_v41, %v1593_v25  ;;  %v1058_v35 = vsel %vm1033_vm1, %v1008_v10, %v1009_v26 }
  0x85   : > { %v1251_v38 = vadd.f32 %v1219_v30, %v1183_v27  ;;  %v1287_v24 = vmul.f32 %v2431_v14, %v2532_v9  ;;  %1794 = vst [vmem:[%s2557_s24 + $0x18] sm:$0xff] %v1762_v31  ;;  %vm768_vm10 = vcmp.le.s32.totalorder %v358_v59, 14  ;;  %v1355_v63 = vmul.f32 %v2433_v15, %v2547_v37 }
  0x86   : > { %v1693_v39 = vadd.f32 %v1490_v21, %v1318_v61  ;;  %v1391_v6 = vmul.f32 %v2435_v16, %v2594_v11  ;;  %v2672_v42 = vsel %vm768_vm10, %v1058_v35, 0.0  ;;  %v1459_v44 = vmul.f32 %v2437_v17, %v2599_v28  ;;  %v2718_v21 = vld [vmem:[%s2399_s6 + $0x50] sm:$0xff] }
  0x87   : > { %v1319_v46 = vadd.f32 %v1287_v24, %v1251_v38  ;;  %v1527_v47 = vmul.f32 %v2465_v29, %v2616_v45  ;;  %v1562_v48 = vmul.f32 %v2453_v22, %v2661_v32  ;;  %v1630_v50 = vmul.f32 %v2471_v34, %v2672_v42 }
  0x88   : > { %v1725_v10 = vadd.f32 %v1693_v39, %v1661_v33  ;;  %v1423_v9 = vadd.f32 %v1391_v6, %v1355_v63  ;;  %v265_v40 = vadd.s32 80, %v2409_v1  ;;  %v835_v12 = vrot.slane %v2650_v18, 7 }
  0x89   : > { %v1010_v52 = vrot.slane %v2683_v20, 1  ;;  %v1184_v54 = vmul.f32 %v2429_v13, %v2509_v57  ;;  %v1594_v43 = vadd.f32 %v1562_v48, %v1527_v47  ;;  %v1220_v36 = vmul.f32 %v2417_v8, %v2568_v51 }
  0x8a   : > { %v1763_v56 = vadd.f32 %v2530_v7, %v1725_v10  ;;  %v1491_v23 = vadd.f32 %v1459_v44, %v1423_v9  ;;  %v365_v58 = vand.u32 15, %v265_v40  ;;  %v884_v60 = vsel %vm859_vm0, %v834_v19, %v835_v12 }
  0x8b   : > { %v2697_v61 = vsel %vm1033_vm1, %v1009_v26, %v1010_v52  ;;  %v1288_v0 = vmul.f32 %v2431_v14, %v2564_v49  ;;  %v1662_v57 = vadd.f32 %v1630_v50, %v1594_v43  ;;  %v1252_v41 = vadd.f32 %v1220_v36, %v1184_v54  ;;  %v2751_v43 = vld [vmem:[%s2399_s6 + $0x58] sm:$0xff] }
  0x8c   : > { %1795 = vst [vmem:[%s2557_s24 + $0x20] sm:$0xff] %v1763_v56  ;;  %v1694_v2 = vadd.f32 %v1491_v23, %v1319_v46  ;;  %v1356_v3 = vmul.f32 %v2433_v15, %v2584_v62  ;;  %vm733_vm11 = vcmp.ge.s32.totalorder %v365_v58, 1  ;;  %v1392_v51 = vmul.f32 %v2435_v16, %v2631_v55 }
  0x8d   : > { %v1460_v4 = vmul.f32 %v2437_v17, %v2629_v53  ;;  %v1528_v5 = vmul.f32 %v2465_v29, %v2650_v18  ;;  %v2710_v49 = vsel %vm733_vm11, %v884_v60, 0.0  ;;  %v1320_v25 = vadd.f32 %v1288_v0, %v1252_v41 }
  0x8e   : > { %v1726_v19 = vadd.f32 %v1694_v2, %v1662_v57  ;;  %v1631_v26 = vmul.f32 %v2471_v34, %v2697_v61  ;;  %v1424_v27 = vadd.f32 %v1392_v51, %v1356_v3  ;;  %v1563_v30 = vmul.f32 %v2453_v22, %v2710_v49 }
  0x8f   : > { %v266_v31 = vadd.s32 88, %v2409_v1  ;;  %v836_v59 = vrot.slane %v2683_v20, 7  ;;  %v1011_v35 = vrot.slane %v2718_v21, 1  ;;  %v1185_v38 = vmul.f32 %v2429_v13, %v2547_v37 }
  0x90   : > { %v1764_v33 = vadd.f32 %v2530_v7, %v1726_v19  ;;  %v1221_v24 = vmul.f32 %v2417_v8, %v2594_v11  ;;  %v1492_v39 = vadd.f32 %v1460_v4, %v1424_v27  ;;  %v1595_v63 = vadd.f32 %v1563_v30, %v1528_v5 }
  0x91   : > { %v372_v6 = vand.u32 15, %v266_v31  ;;  %v2729_v46 = vsel %vm859_vm0, %v835_v12, %v836_v59  ;;  %v1056_v44 = vsel %vm1033_vm1, %v1010_v52, %v1011_v35  ;;  %v1289_v10 = vmul.f32 %v2431_v14, %v2599_v28 }
  0x92   : > { %1796 = vst [vmem:[%s2557_s24 + $0x28] sm:$0xff] %v1764_v33  ;;  %v1253_v47 = vadd.f32 %v1221_v24, %v1185_v38  ;;  %v1357_v37 = vmul.f32 %v2433_v15, %v2616_v45  ;;  %v1663_v11 = vadd.f32 %v1631_v26, %v1595_v63  ;;  %v1695_v9 = vadd.f32 %v1492_v39, %v1320_v25  ;;  %v2786_v63 = vld [vmem:[%s2399_s6 + $0x60] sm:$0xff] }
  0x93   : > { %vm770_vm12 = vcmp.le.s32.totalorder %v372_v6, 14  ;;  %v1393_v48 = vmul.f32 %v2435_v16, %v2661_v32  ;;  %v1461_v12 = vmul.f32 %v2437_v17, %v2672_v42  ;;  %v1529_v52 = vmul.f32 %v2465_v29, %v2683_v20 }
  0x94   : > { %v2740_v50 = vsel %vm770_vm12, %v1056_v44, 0.0  ;;  %v1321_v40 = vadd.f32 %v1289_v10, %v1253_v47  ;;  %v1727_v54 = vadd.f32 %v1695_v9, %v1663_v11  ;;  %v1564_v56 = vmul.f32 %v2453_v22, %v2729_v46 }
  0x95   : > { %v1425_v28 = vadd.f32 %v1393_v48, %v1357_v37  ;;  %v1632_v23 = vmul.f32 %v2471_v34, %v2740_v50  ;;  %v267_v36 = vadd.s32 96, %v2409_v1  ;;  %v837_v58 = vrot.slane %v2718_v21, 7 }
  0x96   : > { %v1012_v60 = vrot.slane %v2751_v43, 1  ;;  %v1186_v0 = vmul.f32 %v2429_v13, %v2584_v62  ;;  %v1765_v57 = vadd.f32 %v2530_v7, %v1727_v54  ;;  %v1596_v41 = vadd.f32 %v1564_v56, %v1529_v52 }
  0x97   : > { %v1493_v2 = vadd.f32 %v1461_v12, %v1425_v28  ;;  %v1222_v3 = vmul.f32 %v2417_v8, %v2631_v55  ;;  %v379_v51 = vand.u32 15, %v267_v36  ;;  %v882_v4 = vsel %vm859_vm0, %v836_v59, %v837_v58 }
  0x98   : > { %v2765_v5 = vsel %vm1033_vm1, %v1011_v35, %v1012_v60  ;;  %v1290_v19 = vmul.f32 %v2431_v14, %v2629_v53  ;;  %1797 = vst [vmem:[%s2557_s24 + $0x30] sm:$0xff] %v1765_v57  ;;  %v1664_v62 = vadd.f32 %v1632_v23, %v1596_v41  ;;  %v1358_v27 = vmul.f32 %v2433_v15, %v2650_v18  ;;  %v2819_v41 = vld [vmem:[%s2399_s6 + $0x68] sm:$0xff] }
  0x99   : > { %v1696_v25 = vadd.f32 %v1493_v2, %v1321_v40  ;;  %v1254_v26 = vadd.f32 %v1222_v3, %v1186_v0  ;;  %vm735_vm13 = vcmp.ge.s32.totalorder %v379_v51, 1  ;;  %v1394_v55 = vmul.f32 %v2435_v16, %v2710_v49 }
  0x9a   : > { %v1462_v30 = vmul.f32 %v2437_v17, %v2697_v61  ;;  %v1530_v31 = vmul.f32 %v2465_v29, %v2718_v21  ;;  %v2778_v53 = vsel %vm735_vm13, %v882_v4, 0.0  ;;  %v1633_v35 = vmul.f32 %v2471_v34, %v2765_v5 }
  0x9b   : > { %v1728_v59 = vadd.f32 %v1696_v25, %v1664_v62  ;;  %v1322_v33 = vadd.f32 %v1290_v19, %v1254_v26  ;;  %v1426_v38 = vadd.f32 %v1394_v55, %v1358_v27  ;;  %v1565_v24 = vmul.f32 %v2453_v22, %v2778_v53 }
  0x9c   : > { %v268_v39 = vadd.s32 104, %v2409_v1  ;;  %v838_v6 = vrot.slane %v2751_v43, 7  ;;  %v1013_v47 = vrot.slane %v2786_v63, 1  ;;  %v1187_v10 = vmul.f32 %v2429_v13, %v2616_v45 }
  0x9d   : > { %v1766_v44 = vadd.f32 %v2530_v7, %v1728_v59  ;;  %v1223_v37 = vmul.f32 %v2417_v8, %v2661_v32  ;;  %v1494_v11 = vadd.f32 %v1462_v30, %v1426_v38  ;;  %v1597_v9 = vadd.f32 %v1565_v24, %v1530_v31 }
  0x9e   : > { %v386_v48 = vand.u32 15, %v268_v39  ;;  %v2797_v40 = vsel %vm859_vm0, %v837_v58, %v838_v6  ;;  %v1054_v12 = vsel %vm1033_vm1, %v1012_v60, %v1013_v47  ;;  %v1291_v54 = vmul.f32 %v2431_v14, %v2672_v42 }
  0x9f   : > { %1798 = vst [vmem:[%s2557_s24 + $0x38] sm:$0xff] %v1766_v44  ;;  %v1255_v52 = vadd.f32 %v1223_v37, %v1187_v10  ;;  %v1359_v45 = vmul.f32 %v2433_v15, %v2683_v20  ;;  %v1665_v32 = vadd.f32 %v1633_v35, %v1597_v9  ;;  %v1697_v28 = vadd.f32 %v1494_v11, %v1322_v33  ;;  %v2854_v9 = vld [vmem:[%s2399_s6 + $0x70] sm:$0xff] }
  0xa0   : > { %vm772_vm14 = vcmp.le.s32.totalorder %v386_v48, 14  ;;  %v1395_v56 = vmul.f32 %v2435_v16, %v2729_v46  ;;  %v1463_v58 = vmul.f32 %v2437_v17, %v2740_v50  ;;  %v1531_v60 = vmul.f32 %v2465_v29, %v2751_v43 }
  0xa1   : > { %v2808_v23 = vsel %vm772_vm14, %v1054_v12, 0.0  ;;  %v1323_v36 = vadd.f32 %v1291_v54, %v1255_v52  ;;  %v1729_v0 = vadd.f32 %v1697_v28, %v1665_v32  ;;  %v1566_v57 = vmul.f32 %v2453_v22, %v2797_v40 }
  0xa2   : > { %v1427_v42 = vadd.f32 %v1395_v56, %v1359_v45  ;;  %v1634_v2 = vmul.f32 %v2471_v34, %v2808_v23  ;;  %v269_v3 = vadd.s32 112, %v2409_v1  ;;  %v839_v51 = vrot.slane %v2786_v63, 7 }
  0xa3   : > { %v1014_v4 = vrot.slane %v2819_v41, 1  ;;  %v1188_v19 = vmul.f32 %v2429_v13, %v2650_v18  ;;  %v1767_v62 = vadd.f32 %v2530_v7, %v1729_v0  ;;  %v1598_v26 = vadd.f32 %v1566_v57, %v1531_v60 }
  0xa4   : > { %v1495_v25 = vadd.f32 %v1463_v58, %v1427_v42  ;;  %v1224_v27 = vmul.f32 %v2417_v8, %v2710_v49  ;;  %v393_v55 = vand.u32 15, %v269_v3  ;;  %v880_v30 = vsel %vm859_vm0, %v838_v6, %v839_v51 }
  0xa5   : > { %v2833_v31 = vsel %vm1033_vm1, %v1013_v47, %v1014_v4  ;;  %v1292_v59 = vmul.f32 %v2431_v14, %v2697_v61  ;;  %1799 = vst [vmem:[%s2557_s24 + $0x40] sm:$0xff] %v1767_v62  ;;  %v1666_v18 = vadd.f32 %v1634_v2, %v1598_v26  ;;  %v1360_v38 = vmul.f32 %v2433_v15, %v2718_v21  ;;  %v2887_v26 = vld [vmem:[%s2399_s6 + $0x78] sm:$0xff] }
  0xa6   : > { %v1698_v33 = vadd.f32 %v1495_v25, %v1323_v36  ;;  %v1256_v35 = vadd.f32 %v1224_v27, %v1188_v19  ;;  %vm737_vm15 = vcmp.ge.s32.totalorder %v393_v55, 1  ;;  %v1396_v49 = vmul.f32 %v2435_v16, %v2778_v53 }
  0xa7   : > { %v1464_v24 = vmul.f32 %v2437_v17, %v2765_v5  ;;  %v1532_v39 = vmul.f32 %v2465_v29, %v2786_v63  ;;  %v2846_v61 = vsel %vm737_vm15, %v880_v30, 0.0  ;;  %v1635_v47 = vmul.f32 %v2471_v34, %v2833_v31 }
  0xa8   : > { %v1730_v6 = vadd.f32 %v1698_v33, %v1666_v18  ;;  %v1324_v44 = vadd.f32 %v1292_v59, %v1256_v35  ;;  %v1428_v10 = vadd.f32 %v1396_v49, %v1360_v38  ;;  %v1567_v37 = vmul.f32 %v2453_v22, %v2846_v61 }
  0xa9   : > { %v270_v11 = vadd.s32 120, %v2409_v1  ;;  %v840_v48 = vrot.slane %v2819_v41, 7  ;;  %v1015_v52 = vrot.slane %v2854_v9, 1  ;;  %v1189_v54 = vmul.f32 %v2429_v13, %v2683_v20 }
  0xaa   : > { %v1768_v12 = vadd.f32 %v2530_v7, %v1730_v6  ;;  %v1225_v45 = vmul.f32 %v2417_v8, %v2729_v46  ;;  %v1496_v32 = vadd.f32 %v1464_v24, %v1428_v10  ;;  %v1599_v28 = vadd.f32 %v1567_v37, %v1532_v39 }
  0xab   : > { %v400_v56 = vand.u32 15, %v270_v11  ;;  %v2865_v36 = vsel %vm859_vm0, %v839_v51, %v840_v48  ;;  %v1052_v58 = vsel %vm1033_vm1, %v1014_v4, %v1015_v52  ;;  %v1293_v0 = vmul.f32 %v2431_v14, %v2740_v50 }
  0xac   : > { %1800 = vst [vmem:[%s2557_s24 + $0x48] sm:$0xff] %v1768_v12  ;;  %v1257_v60 = vadd.f32 %v1225_v45, %v1189_v54  ;;  %v1361_v20 = vmul.f32 %v2433_v15, %v2751_v43  ;;  %v1667_v46 = vadd.f32 %v1635_v47, %v1599_v28  ;;  %v1699_v42 = vadd.f32 %v1496_v32, %v1324_v44  ;;  %v2922_v28 = vld [vmem:[%s2399_s6 + $0x80] sm:$0xff] }
  0xad   : > { %vm774_vm2 = vcmp.le.s32.totalorder %v400_v56, 14  ;;  %v1397_v57 = vmul.f32 %v2435_v16, %v2797_v40  ;;  %v1465_v51 = vmul.f32 %v2437_v17, %v2808_v23  ;;  %v1533_v4 = vmul.f32 %v2465_v29, %v2819_v41 }
  0xae   : > { %v2876_v2 = vsel %vm774_vm2, %v1052_v58, 0.0  ;;  %v1325_v3 = vadd.f32 %v1293_v0, %v1257_v60  ;;  %v1731_v19 = vadd.f32 %v1699_v42, %v1667_v46  ;;  %v1568_v62 = vmul.f32 %v2453_v22, %v2865_v36 }
  0xaf   : > { %v1429_v50 = vadd.f32 %v1397_v57, %v1361_v20  ;;  %v1636_v25 = vmul.f32 %v2471_v34, %v2876_v2  ;;  %v271_v27 = vadd.s32 128, %v2409_v1  ;;  %v841_v55 = vrot.slane %v2854_v9, 7 }
  0xb0   : > { %v1016_v30 = vrot.slane %v2887_v26, 1  ;;  %v1190_v59 = vmul.f32 %v2429_v13, %v2718_v21  ;;  %v1769_v18 = vadd.f32 %v2530_v7, %v1731_v19  ;;  %v1600_v35 = vadd.f32 %v1568_v62, %v1533_v4 }
  0xb1   : > { %v1497_v33 = vadd.f32 %v1465_v51, %v1429_v50  ;;  %v1226_v38 = vmul.f32 %v2417_v8, %v2778_v53  ;;  %v407_v49 = vand.u32 15, %v271_v27  ;;  %v878_v24 = vsel %vm859_vm0, %v840_v48, %v841_v55 }
  0xb2   : > { %v2901_v39 = vsel %vm1033_vm1, %v1015_v52, %v1016_v30  ;;  %v1294_v6 = vmul.f32 %v2431_v14, %v2765_v5  ;;  %1801 = vst [vmem:[%s2557_s24 + $0x50] sm:$0xff] %v1769_v18  ;;  %v1668_v21 = vadd.f32 %v1636_v25, %v1600_v35  ;;  %v1362_v10 = vmul.f32 %v2433_v15, %v2786_v63  ;;  %v2955_v35 = vld [vmem:[%s2399_s6 + $0x88] sm:$0xff] }
  0xb3   : > { %v1700_v44 = vadd.f32 %v1497_v33, %v1325_v3  ;;  %v1258_v47 = vadd.f32 %v1226_v38, %v1190_v59  ;;  %vm739_vm3 = vcmp.ge.s32.totalorder %v407_v49, 1  ;;  %v1398_v53 = vmul.f32 %v2435_v16, %v2846_v61 }
  0xb4   : > { %v1466_v37 = vmul.f32 %v2437_v17, %v2833_v31  ;;  %v1534_v11 = vmul.f32 %v2465_v29, %v2854_v9  ;;  %v2914_v5 = vsel %vm739_vm3, %v878_v24, 0.0  ;;  %v1637_v52 = vmul.f32 %v2471_v34, %v2901_v39 }
  0xb5   : > { %v1732_v48 = vadd.f32 %v1700_v44, %v1668_v21  ;;  %v1326_v12 = vadd.f32 %v1294_v6, %v1258_v47  ;;  %v1430_v54 = vadd.f32 %v1398_v53, %v1362_v10  ;;  %v1569_v45 = vmul.f32 %v2453_v22, %v2914_v5 }
  0xb6   : > { %v272_v32 = vadd.s32 136, %v2409_v1  ;;  %v842_v56 = vrot.slane %v2887_v26, 7  ;;  %v1017_v60 = vrot.slane %v2922_v28, 1  ;;  %v1191_v0 = vmul.f32 %v2429_v13, %v2751_v43 }
  0xb7   : > { %v1770_v58 = vadd.f32 %v2530_v7, %v1732_v48  ;;  %v1227_v20 = vmul.f32 %v2417_v8, %v2797_v40  ;;  %v1498_v46 = vadd.f32 %v1466_v37, %v1430_v54  ;;  %v1601_v42 = vadd.f32 %v1569_v45, %v1534_v11 }
  0xb8   : > { %v414_v57 = vand.u32 15, %v272_v32  ;;  %v2933_v3 = vsel %vm859_vm0, %v841_v55, %v842_v56  ;;  %v1050_v51 = vsel %vm1033_vm1, %v1016_v30, %v1017_v60  ;;  %v1295_v19 = vmul.f32 %v2431_v14, %v2808_v23 }
  0xb9   : > { %1802 = vst [vmem:[%s2557_s24 + $0x58] sm:$0xff] %v1770_v58  ;;  %v1259_v4 = vadd.f32 %v1227_v20, %v1191_v0  ;;  %v1363_v43 = vmul.f32 %v2433_v15, %v2819_v41  ;;  %v1669_v40 = vadd.f32 %v1637_v52, %v1601_v42  ;;  %v1701_v50 = vadd.f32 %v1498_v46, %v1326_v12  ;;  %v2990_v42 = vld [vmem:[%s2399_s6 + $0x90] sm:$0xff] }
  0xba   : > { %vm776_vm4 = vcmp.le.s32.totalorder %v414_v57, 14  ;;  %v1399_v62 = vmul.f32 %v2435_v16, %v2865_v36  ;;  %v1467_v55 = vmul.f32 %v2437_v17, %v2876_v2  ;;  %v1535_v30 = vmul.f32 %v2465_v29, %v2887_v26 }
  0xbb   : > { %v2944_v25 = vsel %vm776_vm4, %v1050_v51, 0.0  ;;  %v1327_v27 = vadd.f32 %v1295_v19, %v1259_v4  ;;  %v1733_v59 = vadd.f32 %v1701_v50, %v1669_v40  ;;  %v1570_v18 = vmul.f32 %v2453_v22, %v2933_v3 }
  0xbc   : > { %v1431_v23 = vadd.f32 %v1399_v62, %v1363_v43  ;;  %v1638_v33 = vmul.f32 %v2471_v34, %v2944_v25  ;;  %v273_v38 = vadd.s32 144, %v2409_v1  ;;  %v843_v49 = vrot.slane %v2922_v28, 7 }
  0xbd   : > { %v1018_v24 = vrot.slane %v2955_v35, 1  ;;  %v1192_v6 = vmul.f32 %v2429_v13, %v2786_v63  ;;  %v1771_v21 = vadd.f32 %v2530_v7, %v1733_v59  ;;  %v1602_v47 = vadd.f32 %v1570_v18, %v1535_v30 }
  0xbe   : > { %v1499_v44 = vadd.f32 %v1467_v55, %v1431_v23  ;;  %v1228_v10 = vmul.f32 %v2417_v8, %v2846_v61  ;;  %v421_v53 = vand.u32 15, %v273_v38  ;;  %v876_v37 = vsel %vm859_vm0, %v842_v56, %v843_v49 }
  0xbf   : > { %v2969_v11 = vsel %vm1033_vm1, %v1017_v60, %v1018_v24  ;;  %v1296_v48 = vmul.f32 %v2431_v14, %v2833_v31  ;;  %1803 = vst [vmem:[%s2557_s24 + $0x60] sm:$0xff] %v1771_v21  ;;  %v1670_v63 = vadd.f32 %v1638_v33, %v1602_v47  ;;  %v1364_v54 = vmul.f32 %v2433_v15, %v2854_v9  ;;  %v3023_v47 = vld [vmem:[%s2399_s6 + $0x98] sm:$0xff] }
  0xc0   : > { %v1702_v12 = vadd.f32 %v1499_v44, %v1327_v27  ;;  %v1260_v52 = vadd.f32 %v1228_v10, %v1192_v6  ;;  %vm741_vm5 = vcmp.ge.s32.totalorder %v421_v53, 1  ;;  %v1400_v61 = vmul.f32 %v2435_v16, %v2914_v5 }
  0xc1   : > { %v1468_v45 = vmul.f32 %v2437_v17, %v2901_v39  ;;  %v1536_v32 = vmul.f32 %v2465_v29, %v2922_v28  ;;  %v2982_v31 = vsel %vm741_vm5, %v876_v37, 0.0  ;;  %v1639_v60 = vmul.f32 %v2471_v34, %v2969_v11 }
  0xc2   : > { %v1734_v56 = vadd.f32 %v1702_v12, %v1670_v63  ;;  %v1328_v58 = vadd.f32 %v1296_v48, %v1260_v52  ;;  %v1432_v0 = vadd.f32 %v1400_v61, %v1364_v54  ;;  %v1571_v20 = vmul.f32 %v2453_v22, %v2982_v31 }
  0xc3   : > { %v274_v46 = vadd.s32 152, %v2409_v1  ;;  %v844_v57 = vrot.slane %v2955_v35, 7  ;;  %v1019_v4 = vrot.slane %v2990_v42, 1  ;;  %v1193_v19 = vmul.f32 %v2429_v13, %v2819_v41 }
  0xc4   : > { %v1772_v51 = vadd.f32 %v2530_v7, %v1734_v56  ;;  %v1229_v43 = vmul.f32 %v2417_v8, %v2865_v36  ;;  %v1500_v40 = vadd.f32 %v1468_v45, %v1432_v0  ;;  %v1603_v50 = vadd.f32 %v1571_v20, %v1536_v32 }
  0xc5   : > { %v428_v62 = vand.u32 15, %v274_v46  ;;  %v3001_v27 = vsel %vm859_vm0, %v843_v49, %v844_v57  ;;  %v1048_v55 = vsel %vm1033_vm1, %v1018_v24, %v1019_v4  ;;  %v1297_v59 = vmul.f32 %v2431_v14, %v2876_v2 }
  0xc6   : > { %1804 = vst [vmem:[%s2557_s24 + $0x68] sm:$0xff] %v1772_v51  ;;  %v1261_v30 = vadd.f32 %v1229_v43, %v1193_v19  ;;  %v1365_v41 = vmul.f32 %v2433_v15, %v2887_v26  ;;  %v1671_v36 = vadd.f32 %v1639_v60, %v1603_v50  ;;  %v1703_v23 = vadd.f32 %v1500_v40, %v1328_v58  ;;  %v3058_v50 = vld [vmem:[%s2399_s6 + $0xa0] sm:$0xff] }
  0xc7   : > { %vm778_vm6 = vcmp.le.s32.totalorder %v428_v62, 14  ;;  %v1401_v18 = vmul.f32 %v2435_v16, %v2933_v3  ;;  %v1469_v49 = vmul.f32 %v2437_v17, %v2944_v25  ;;  %v1537_v24 = vmul.f32 %v2465_v29, %v2955_v35 }
  0xc8   : > { %v3012_v33 = vsel %vm778_vm6, %v1048_v55, 0.0  ;;  %v1329_v38 = vadd.f32 %v1297_v59, %v1261_v30  ;;  %v1735_v6 = vadd.f32 %v1703_v23, %v1671_v36  ;;  %v1572_v21 = vmul.f32 %v2453_v22, %v3001_v27 }
  0xc9   : > { %v1433_v2 = vadd.f32 %v1401_v18, %v1365_v41  ;;  %v1640_v44 = vmul.f32 %v2471_v34, %v3012_v33  ;;  %v275_v10 = vadd.s32 160, %v2409_v1  ;;  %v845_v53 = vrot.slane %v2990_v42, 7 }
  0xca   : > { %v1020_v37 = vrot.slane %v3023_v47, 1  ;;  %v1194_v48 = vmul.f32 %v2429_v13, %v2854_v9  ;;  %v1773_v63 = vadd.f32 %v2530_v7, %v1735_v6  ;;  %v1604_v52 = vadd.f32 %v1572_v21, %v1537_v24 }
  0xcb   : > { %v1501_v12 = vadd.f32 %v1469_v49, %v1433_v2  ;;  %v1230_v54 = vmul.f32 %v2417_v8, %v2914_v5  ;;  %v435_v61 = vand.u32 15, %v275_v10  ;;  %v874_v45 = vsel %vm859_vm0, %v844_v57, %v845_v53 }
  0xcc   : > { %v3037_v32 = vsel %vm1033_vm1, %v1019_v4, %v1020_v37  ;;  %v1298_v56 = vmul.f32 %v2431_v14, %v2901_v39  ;;  %1805 = vst [vmem:[%s2557_s24 + $0x70] sm:$0xff] %v1773_v63  ;;  %v1672_v9 = vadd.f32 %v1640_v44, %v1604_v52  ;;  %v1366_v0 = vmul.f32 %v2433_v15, %v2922_v28  ;;  %v3096_v63 = vld [vmem:[#allocation5 + $0x1] ss:$0 sm:$0xff] }
  0xcd   : > { %v1704_v58 = vadd.f32 %v1501_v12, %v1329_v38  ;;  %v1262_v60 = vadd.f32 %v1230_v54, %v1194_v48  ;;  %vm743_vm7 = vcmp.ge.s32.totalorder %v435_v61, 1  ;;  %v1402_v5 = vmul.f32 %v2435_v16, %v2982_v31  ;;  %v3101_v54 = vld [vmem:[#allocation5] ss:$0 sm:$0xff] }
  0xce   : > { %v1470_v20 = vmul.f32 %v2437_v17, %v2969_v11  ;;  %v1538_v46 = vmul.f32 %v2465_v29, %v2990_v42  ;;  %v3050_v39 = vsel %vm743_vm7, %v874_v45, 0.0  ;;  %v1641_v4 = vmul.f32 %v2471_v34, %v3037_v32 }
  0xcf   : > { %v1736_v57 = vadd.f32 %v1704_v58, %v1672_v9  ;;  %v1330_v51 = vadd.f32 %v1298_v56, %v1262_v60  ;;  %v1434_v19 = vadd.f32 %v1402_v5, %v1366_v0  ;;  %v1573_v43 = vmul.f32 %v2453_v22, %v3050_v39  ;;  %v3111_v9 = vld [vmem:[#allocation5 + $0x2] ss:$0 sm:$0xff]  ;;  %v3116_v5 = vld [vmem:[#allocation5 + $0x5] ss:$0 sm:$0xff] }
  0xd0   : > { %v276_v40 = vadd.s32 168, %v2409_v1  ;;  %v846_v62 = vrot.slane %v3023_v47, 7  ;;  %v1021_v30 = vrot.slane %v3058_v50, 1  ;;  %v1195_v59 = vmul.f32 %v2429_v13, %v2887_v26 }
  0xd1   : > { %v1774_v55 = vadd.f32 %v2530_v7, %v1736_v57  ;;  %v1231_v41 = vmul.f32 %v2417_v8, %v2933_v3  ;;  %v1502_v36 = vadd.f32 %v1470_v20, %v1434_v19  ;;  %v1605_v23 = vadd.f32 %v1573_v43, %v1538_v46  ;;  %v3120_v20 = vld [vmem:[#allocation5 + $0x4] ss:$0 sm:$0xff]  ;;  %v3124_v57 = vld [vmem:[#allocation5 + $0x6] ss:$0 sm:$0xff] }
  0xd2   : > { %v442_v18 = vand.u32 15, %v276_v40  ;;  %v3069_v38 = vsel %vm859_vm0, %v845_v53, %v846_v62  ;;  %v1046_v49 = vsel %vm1033_vm1, %v1020_v37, %v1021_v30  ;;  %v1299_v6 = vmul.f32 %v2431_v14, %v2944_v25  ;;  %v3091_v37 = vld [vmem:[%s2399_s6 + $0xa8] sm:$0xff] }
  0xd3   : > { %1806 = vst [vmem:[%s2557_s24 + $0x78] sm:$0xff] %v1774_v55  ;;  %v1263_v24 = vadd.f32 %v1231_v41, %v1195_v59  ;;  %v1367_v13 = vmul.f32 %v2433_v15, %v2955_v35  ;;  %v1673_v8 = vadd.f32 %v1641_v4, %v1605_v23  ;;  %v1705_v26 = vadd.f32 %v1502_v36, %v1330_v51  ;;  %v3128_v51 = vld [vmem:[#allocation5 + $0x9] ss:$0 sm:$0xff]  ;;  %v3138_v59 = vld [vmem:[#allocation5 + $0x8] ss:$0 sm:$0xff]  ;;  %v3144_v23 = vld [vmem:[%s2399_s6 + $0xb0] sm:$0xff] }
  0xd4   : > { %vm780_vm8 = vcmp.le.s32.totalorder %v442_v18, 14  ;;  %v1403_v3 = vmul.f32 %v2435_v16, %v3001_v27  ;;  %v1471_v44 = vmul.f32 %v2437_v17, %v3012_v33  ;;  %v1539_v10 = vmul.f32 %v2465_v29, %v3023_v47 }
  0xd5   : > { %v3080_v2 = vsel %vm780_vm8, %v1046_v49, 0.0  ;;  %v1331_v21 = vadd.f32 %v1299_v6, %v1263_v24  ;;  %v1737_v53 = vadd.f32 %v1705_v26, %v1673_v8  ;;  %v1574_v15 = vmul.f32 %v2453_v22, %v3069_v38 }
  0xd6   : > { %v1435_v14 = vadd.f32 %v1403_v3, %v1367_v13  ;;  %v1642_v25 = vmul.f32 %v2471_v34, %v3080_v2  ;;  %v277_v16 = vadd.s32 176, %v2409_v1  ;;  %v847_v48 = vrot.slane %v3058_v50, 7 }
  0xd7   : > { %v1022_v17 = vrot.slane %v3091_v37, 1  ;;  %v1196_v29 = vmul.f32 %v3096_v63, %v2922_v28  ;;  %v1775_v12 = vadd.f32 %v2530_v7, %v1737_v53  ;;  %v1606_v52 = vadd.f32 %v1574_v15, %v1539_v10 }
  0xd8   : > { %v1503_v22 = vadd.f32 %v1471_v44, %v1435_v14  ;;  %v1232_v34 = vmul.f32 %v3101_v54, %v2982_v31  ;;  %v449_v61 = vand.u32 15, %v277_v16  ;;  %v872_v45 = vsel %vm859_vm0, %v846_v62, %v847_v48  ;;  %v3134_v62 = vld [vmem:[#allocation5 + $0xa] ss:$0 sm:$0xff] }
  0xd9   : > { %v3109_v56 = vsel %vm1033_vm1, %v1021_v30, %v1022_v17  ;;  %v1300_v28 = vmul.f32 %v3111_v9, %v2969_v11  ;;  %1807 = vst [vmem:[%s2557_s24 + $0x80] sm:$0xff] %v1775_v12  ;;  %v1674_v58 = vadd.f32 %v1642_v25, %v1606_v52  ;;  %v1368_v31 = vmul.f32 %v3116_v5, %v2990_v42 }
  0xda   : > { %v1706_v60 = vadd.f32 %v1503_v22, %v1331_v21  ;;  %v1264_v0 = vadd.f32 %v1232_v34, %v1196_v29  ;;  %vm745_vm9 = vcmp.ge.s32.totalorder %v449_v61, 1  ;;  %v1404_v46 = vmul.f32 %v3120_v20, %v3050_v39  ;;  %v3177_v22 = vld [vmem:[%s2399_s6 + $0xb8] sm:$0xff] }
  0xdb   : > { %v1472_v11 = vmul.f32 %v3124_v57, %v3037_v32  ;;  %v1540_v4 = vmul.f32 %v3128_v51, %v3058_v50  ;;  %v3132_v43 = vsel %vm745_vm9, %v872_v45, 0.0  ;;  %v1643_v55 = vmul.f32 %v3134_v62, %v3109_v56 }
  0xdc   : > { %v1738_v19 = vadd.f32 %v1706_v60, %v1674_v58  ;;  %v1332_v40 = vadd.f32 %v1300_v28, %v1264_v0  ;;  %v1436_v30 = vadd.f32 %v1404_v46, %v1368_v31  ;;  %v1575_v41 = vmul.f32 %v3138_v59, %v3132_v43  ;;  %v3187_v28 = vld [vmem:[%s3598_s2] ss:$0 sm:$0xff] }
  0xdd   : > { %v278_v36 = vadd.s32 184, %v2409_v1  ;;  %v848_v18 = vrot.slane %v3091_v37, 7  ;;  %v1023_v24 = vrot.slane %v3144_v23, 1  ;;  %v1197_v6 = vmul.f32 %v3096_v63, %v2955_v35 }
  0xde   : > { %v1776_v49 = vadd.f32 %v2530_v7, %v1738_v19  ;;  %v1233_v13 = vmul.f32 %v3101_v54, %v3001_v27  ;;  %v1504_v8 = vadd.f32 %v1472_v11, %v1436_v30  ;;  %v1607_v26 = vadd.f32 %v1575_v41, %v1540_v4 }
  0xdf   : > { %v456_v3 = vand.u32 15, %v278_v36  ;;  %v3155_v21 = vsel %vm859_vm0, %v847_v48, %v848_v18  ;;  %v1044_v44 = vsel %vm1033_vm1, %v1022_v17, %v1023_v24  ;;  %v1301_v10 = vmul.f32 %v3111_v9, %v3012_v33 }
  0xe0   : > { %1808 = vst [vmem:[%s2557_s24 + $0x88] sm:$0xff] %v1776_v49  ;;  %v1265_v7 = vadd.f32 %v1233_v13, %v1197_v6  ;;  %v1369_v35 = vmul.f32 %v3116_v5, %v3023_v47  ;;  %v1675_v27 = vadd.f32 %v1643_v55, %v1607_v26  ;;  %v1707_v53 = vadd.f32 %v1504_v8, %v1332_v40  ;;  %v3217_v26 = vld [vmem:[%s2399_s6 + $0xc0] sm:$0xff] }
  0xe1   : > { %vm782_vm10 = vcmp.le.s32.totalorder %v456_v3, 14  ;;  %v1405_v14 = vmul.f32 %v3120_v20, %v3069_v38  ;;  %v1473_v16 = vmul.f32 %v3124_v57, %v3080_v2  ;;  %v1541_v48 = vmul.f32 %v3128_v51, %v3091_v37 }
  0xe2   : > { %v3166_v15 = vsel %vm782_vm10, %v1044_v44, 0.0  ;;  %v1333_v25 = vadd.f32 %v1301_v10, %v1265_v7  ;;  %v1739_v17 = vadd.f32 %v1707_v53, %v1675_v27  ;;  %v1576_v29 = vmul.f32 %v3138_v59, %v3155_v21 }
  0xe3   : > { %v1437_v33 = vadd.f32 %v1405_v14, %v1369_v35  ;;  %v1644_v12 = vmul.f32 %v3134_v62, %v3166_v15  ;;  %v279_v52 = vadd.s32 192, %v2409_v1  ;;  %v849_v34 = vrot.slane %v3144_v23, 7 }
  0xe4   : > { %v1024_v61 = vrot.slane %v3177_v22, 1  ;;  %v1198_v45 = vmul.f32 %v3096_v63, %v2990_v42  ;;  %v1777_v58 = vadd.f32 %v3187_v28, %v1739_v17  ;;  %v1608_v0 = vadd.f32 %v1576_v29, %v1541_v48 }
  0xe5   : > { %v1505_v60 = vadd.f32 %v1473_v16, %v1437_v33  ;;  %v1234_v31 = vmul.f32 %v3101_v54, %v3050_v39  ;;  %v463_v46 = vand.u32 15, %v279_v52  ;;  %v870_v11 = vsel %vm859_vm0, %v848_v18, %v849_v34 }
  0xe6   : > { %v3196_v4 = vsel %vm1033_vm1, %v1023_v24, %v1024_v61  ;;  %v1302_v42 = vmul.f32 %v3111_v9, %v3037_v32  ;;  %1809 = vst [vmem:[%s2557_s24 + $0x90] sm:$0xff] %v1777_v58  ;;  %v1676_v19 = vadd.f32 %v1644_v12, %v1608_v0  ;;  %v1370_v30 = vmul.f32 %v3116_v5, %v3058_v50  ;;  %v3250_v0 = vld [vmem:[%s2399_s6 + $0xc8] sm:$0xff] }
  0xe7   : > { %v1708_v40 = vadd.f32 %v1505_v60, %v1333_v25  ;;  %v1266_v55 = vadd.f32 %v1234_v31, %v1198_v45  ;;  %vm747_vm11 = vcmp.ge.s32.totalorder %v463_v46, 1  ;;  %v1406_v39 = vmul.f32 %v3120_v20, %v3132_v43 }
  0xe8   : > { %v1474_v41 = vmul.f32 %v3124_v57, %v3109_v56  ;;  %v1542_v36 = vmul.f32 %v3128_v51, %v3144_v23  ;;  %v3209_v32 = vsel %vm747_vm11, %v870_v11, 0.0  ;;  %v1645_v24 = vmul.f32 %v3134_v62, %v3196_v4 }
  0xe9   : > { %v1740_v18 = vadd.f32 %v1708_v40, %v1676_v19  ;;  %v1334_v49 = vadd.f32 %v1302_v42, %v1266_v55  ;;  %v1438_v6 = vadd.f32 %v1406_v39, %v1370_v30  ;;  %v1577_v13 = vmul.f32 %v3138_v59, %v3209_v32 }
  0xea   : > { %v280_v8 = vadd.s32 200, %v2409_v1  ;;  %v850_v3 = vrot.slane %v3177_v22, 7  ;;  %v1025_v7 = vrot.slane %v3217_v26, 1  ;;  %v1199_v10 = vmul.f32 %v3096_v63, %v3023_v47 }
  0xeb   : > { %v1778_v44 = vadd.f32 %v3187_v28, %v1740_v18  ;;  %v1235_v35 = vmul.f32 %v3101_v54, %v3069_v38  ;;  %v1506_v27 = vadd.f32 %v1474_v41, %v1438_v6  ;;  %v1609_v53 = vadd.f32 %v1577_v13, %v1542_v36 }
  0xec   : > { %v470_v14 = vand.u32 15, %v280_v8  ;;  %v3228_v25 = vsel %vm859_vm0, %v849_v34, %v850_v3  ;;  %v1042_v16 = vsel %vm1033_vm1, %v1024_v61, %v1025_v7  ;;  %v1303_v17 = vmul.f32 %v3111_v9, %v3080_v2 }
  0xed   : > { %1810 = vst [vmem:[%s2557_s24 + $0x98] sm:$0xff] %v1778_v44  ;;  %v1267_v48 = vadd.f32 %v1235_v35, %v1199_v10  ;;  %v1371_v47 = vmul.f32 %v3116_v5, %v3091_v37  ;;  %v1677_v38 = vadd.f32 %v1645_v24, %v1609_v53  ;;  %v1709_v33 = vadd.f32 %v1506_v27, %v1334_v49  ;;  %v3285_v53 = vld [vmem:[%s2399_s6 + $0xd0] sm:$0xff] }
  0xee   : > { %vm784_vm12 = vcmp.le.s32.totalorder %v470_v14, 14  ;;  %v1407_v29 = vmul.f32 %v3120_v20, %v3155_v21  ;;  %v1475_v34 = vmul.f32 %v3124_v57, %v3166_v15  ;;  %v1543_v61 = vmul.f32 %v3128_v51, %v3177_v22 }
  0xef   : > { %v3239_v12 = vsel %vm784_vm12, %v1042_v16, 0.0  ;;  %v1335_v52 = vadd.f32 %v1303_v17, %v1267_v48  ;;  %v1741_v45 = vadd.f32 %v1709_v33, %v1677_v38  ;;  %v1578_v58 = vmul.f32 %v3138_v59, %v3228_v25 }
  0xf0   : > { %v1439_v2 = vadd.f32 %v1407_v29, %v1371_v47  ;;  %v1646_v60 = vmul.f32 %v3134_v62, %v3239_v12  ;;  %v281_v31 = vadd.s32 208, %v2409_v1  ;;  %v851_v46 = vrot.slane %v3217_v26, 7 }
  0xf1   : > { %v1026_v11 = vrot.slane %v3250_v0, 1  ;;  %v1200_v42 = vmul.f32 %v3096_v63, %v3058_v50  ;;  %v1779_v19 = vadd.f32 %v3187_v28, %v1741_v45  ;;  %v1610_v55 = vadd.f32 %v1578_v58, %v1543_v61 }
  0xf2   : > { %v1507_v40 = vadd.f32 %v1475_v34, %v1439_v2  ;;  %v1236_v30 = vmul.f32 %v3101_v54, %v3132_v43  ;;  %v477_v39 = vand.u32 15, %v281_v31  ;;  %v868_v41 = vsel %vm859_vm0, %v850_v3, %v851_v46 }
  0xf3   : > { %v3264_v36 = vsel %vm1033_vm1, %v1025_v7, %v1026_v11  ;;  %v1304_v18 = vmul.f32 %v3111_v9, %v3109_v56  ;;  %1811 = vst [vmem:[%s2557_s24 + $0xa0] sm:$0xff] %v1779_v19  ;;  %v1678_v50 = vadd.f32 %v1646_v60, %v1610_v55  ;;  %v1372_v6 = vmul.f32 %v3116_v5, %v3144_v23  ;;  %v3318_v55 = vld [vmem:[%s2399_s6 + $0xd8] sm:$0xff] }
  0xf4   : > { %v1710_v49 = vadd.f32 %v1507_v40, %v1335_v52  ;;  %v1268_v24 = vadd.f32 %v1236_v30, %v1200_v42  ;;  %vm749_vm13 = vcmp.ge.s32.totalorder %v477_v39, 1  ;;  %v1408_v43 = vmul.f32 %v3120_v20, %v3209_v32 }
  0xf5   : > { %v1476_v13 = vmul.f32 %v3124_v57, %v3196_v4  ;;  %v1544_v8 = vmul.f32 %v3128_v51, %v3217_v26  ;;  %v3277_v56 = vsel %vm749_vm13, %v868_v41, 0.0  ;;  %v1647_v7 = vmul.f32 %v3134_v62, %v3264_v36 }
  0xf6   : > { %v1742_v3 = vadd.f32 %v1710_v49, %v1678_v50  ;;  %v1336_v44 = vadd.f32 %v1304_v18, %v1268_v24  ;;  %v1440_v10 = vadd.f32 %v1408_v43, %v1372_v6  ;;  %v1579_v35 = vmul.f32 %v3138_v59, %v3277_v56 }
  0xf7   : > { %v282_v27 = vadd.s32 216, %v2409_v1  ;;  %v852_v14 = vrot.slane %v3250_v0, 7  ;;  %v1027_v48 = vrot.slane %v3285_v53, 1  ;;  %v1201_v17 = vmul.f32 %v3096_v63, %v3091_v37 }
  0xf8   : > { %v1780_v16 = vadd.f32 %v3187_v28, %v1742_v3  ;;  %v1237_v47 = vmul.f32 %v3101_v54, %v3155_v21  ;;  %v1508_v38 = vadd.f32 %v1476_v13, %v1440_v10  ;;  %v1611_v33 = vadd.f32 %v1579_v35, %v1544_v8 }
  0xf9   : > { %v484_v29 = vand.u32 15, %v282_v27  ;;  %v3296_v52 = vsel %vm859_vm0, %v851_v46, %v852_v14  ;;  %v1040_v34 = vsel %vm1033_vm1, %v1026_v11, %v1027_v48  ;;  %v1305_v45 = vmul.f32 %v3111_v9, %v3166_v15 }
  0xfa   : > { %1812 = vst [vmem:[%s2557_s24 + $0xa8] sm:$0xff] %v1780_v16  ;;  %v1269_v61 = vadd.f32 %v1237_v47, %v1201_v17  ;;  %v1373_v37 = vmul.f32 %v3116_v5, %v3177_v22  ;;  %v1679_v21 = vadd.f32 %v1647_v7, %v1611_v33  ;;  %v1711_v2 = vadd.f32 %v1508_v38, %v1336_v44  ;;  %v3353_v33 = vld [vmem:[%s2399_s6 + $0xe0] sm:$0xff] }
  0xfb   : > { %vm786_vm14 = vcmp.le.s32.totalorder %v484_v29, 14  ;;  %v1409_v58 = vmul.f32 %v3120_v20, %v3228_v25  ;;  %v1477_v46 = vmul.f32 %v3124_v57, %v3239_v12  ;;  %v1545_v11 = vmul.f32 %v3128_v51, %v3250_v0 }
  0xfc   : > { %v3307_v60 = vsel %vm786_vm14, %v1040_v34, 0.0  ;;  %v1337_v31 = vadd.f32 %v1305_v45, %v1269_v61  ;;  %v1743_v42 = vadd.f32 %v1711_v2, %v1679_v21  ;;  %v1580_v19 = vmul.f32 %v3138_v59, %v3296_v52 }
  0xfd   : > { %v1441_v15 = vadd.f32 %v1409_v58, %v1373_v37  ;;  %v1648_v40 = vmul.f32 %v3134_v62, %v3307_v60  ;;  %v283_v30 = vadd.s32 224, %v2409_v1  ;;  %v853_v39 = vrot.slane %v3285_v53, 7 }
  0xfe   : > { %v1028_v41 = vrot.slane %v3318_v55, 1  ;;  %v1202_v18 = vmul.f32 %v3096_v63, %v3144_v23  ;;  %v1781_v50 = vadd.f32 %v3187_v28, %v1743_v42  ;;  %v1612_v24 = vadd.f32 %v1580_v19, %v1545_v11 }
  0xff   : > { %v1509_v49 = vadd.f32 %v1477_v46, %v1441_v15  ;;  %v1238_v6 = vmul.f32 %v3101_v54, %v3209_v32  ;;  %v491_v43 = vand.u32 15, %v283_v30  ;;  %v866_v13 = vsel %vm859_vm0, %v852_v14, %v853_v39 }
 0x100   : > { %v3332_v8 = vsel %vm1033_vm1, %v1027_v48, %v1028_v41  ;;  %v1306_v3 = vmul.f32 %v3111_v9, %v3196_v4  ;;  %1813 = vst [vmem:[%s2557_s24 + $0xb0] sm:$0xff] %v1781_v50  ;;  %v1680_v23 = vadd.f32 %v1648_v40, %v1612_v24  ;;  %v1374_v10 = vmul.f32 %v3116_v5, %v3217_v26  ;;  %v3386_v24 = vld [vmem:[%s2399_s6 + $0xe8] sm:$0xff] }
 0x101   : > { %v1712_v44 = vadd.f32 %v1509_v49, %v1337_v31  ;;  %v1270_v7 = vadd.f32 %v1238_v6, %v1202_v18  ;;  %vm751_vm15 = vcmp.ge.s32.totalorder %v491_v43, 1  ;;  %v1410_v32 = vmul.f32 %v3120_v20, %v3277_v56 }
 0x102   : > { %v1478_v35 = vmul.f32 %v3124_v57, %v3264_v36  ;;  %v1546_v27 = vmul.f32 %v3128_v51, %v3285_v53  ;;  %v3345_v4 = vsel %vm751_vm15, %v866_v13, 0.0  ;;  %v1649_v48 = vmul.f32 %v3134_v62, %v3332_v8 }
 0x103   : > { %v1744_v14 = vadd.f32 %v1712_v44, %v1680_v23  ;;  %v1338_v16 = vadd.f32 %v1306_v3, %v1270_v7  ;;  %v1442_v17 = vadd.f32 %v1410_v32, %v1374_v10  ;;  %v1581_v47 = vmul.f32 %v3138_v59, %v3345_v4 }
 0x104   : > { %v284_v38 = vadd.s32 232, %v2409_v1  ;;  %v854_v29 = vrot.slane %v3318_v55, 7  ;;  %v1029_v61 = vrot.slane %v3353_v33, 1  ;;  %v1203_v45 = vmul.f32 %v3096_v63, %v3177_v22 }
 0x105   : > { %v1782_v34 = vadd.f32 %v3187_v28, %v1744_v14  ;;  %v1239_v37 = vmul.f32 %v3101_v54, %v3228_v25  ;;  %v1510_v21 = vadd.f32 %v1478_v35, %v1442_v17  ;;  %v1613_v2 = vadd.f32 %v1581_v47, %v1546_v27 }
 0x106   : > { %v498_v58 = vand.u32 15, %v284_v38  ;;  %v3364_v31 = vsel %vm859_vm0, %v853_v39, %v854_v29  ;;  %v1038_v46 = vsel %vm1033_vm1, %v1028_v41, %v1029_v61  ;;  %v1307_v42 = vmul.f32 %v3111_v9, %v3239_v12 }
 0x107   : > { %1814 = vst [vmem:[%s2557_s24 + $0xb8] sm:$0xff] %v1782_v34  ;;  %v1271_v11 = vadd.f32 %v1239_v37, %v1203_v45  ;;  %v1375_v22 = vmul.f32 %v3116_v5, %v3250_v0  ;;  %v1681_v25 = vadd.f32 %v1649_v48, %v1613_v2  ;;  %v1713_v15 = vadd.f32 %v1510_v21, %v1338_v16  ;;  %v3421_v2 = vld [vmem:[%s2399_s6 + $0xf0] sm:$0xff] }
 0x108   : > { %vm788_vm2 = vcmp.le.s32.totalorder %v498_v58, 14  ;;  %v1411_v19 = vmul.f32 %v3120_v20, %v3296_v52  ;;  %v1479_v39 = vmul.f32 %v3124_v57, %v3307_v60  ;;  %v1547_v41 = vmul.f32 %v3128_v51, %v3318_v55 }
 0x109   : > { %v3375_v40 = vsel %vm788_vm2, %v1038_v46, 0.0  ;;  %v1339_v30 = vadd.f32 %v1307_v42, %v1271_v11  ;;  %v1745_v18 = vadd.f32 %v1713_v15, %v1681_v25  ;;  %v1582_v50 = vmul.f32 %v3138_v59, %v3364_v31 }
 0x10a   : > { %v1443_v12 = vadd.f32 %v1411_v19, %v1375_v22  ;;  %v1650_v49 = vmul.f32 %v3134_v62, %v3375_v40  ;;  %v285_v6 = vadd.s32 240, %v2409_v1  ;;  %v855_v43 = vrot.slane %v3353_v33, 7 }
 0x10b   : > { %v1030_v13 = vrot.slane %v3386_v24, 1  ;;  %v1204_v3 = vmul.f32 %v3096_v63, %v3217_v26  ;;  %v1783_v23 = vadd.f32 %v3187_v28, %v1745_v18  ;;  %v1614_v7 = vadd.f32 %v1582_v50, %v1547_v41 }
 0x10c   : > { %v1511_v44 = vadd.f32 %v1479_v39, %v1443_v12  ;;  %v1240_v10 = vmul.f32 %v3101_v54, %v3277_v56  ;;  %v505_v32 = vand.u32 15, %v285_v6  ;;  %v864_v35 = vsel %vm859_vm0, %v854_v29, %v855_v43 }
 0x10d   : > { %v3400_v27 = vsel %vm1033_vm1, %v1029_v61, %v1030_v13  ;;  %v1308_v14 = vmul.f32 %v3111_v9, %v3264_v36  ;;  %1815 = vst [vmem:[%s2557_s24 + $0xc0] sm:$0xff] %v1783_v23  ;;  %v1682_v26 = vadd.f32 %v1650_v49, %v1614_v7  ;;  %v1376_v17 = vmul.f32 %v3116_v5, %v3285_v53  ;;  %v3444_v49 = vld [vmem:[%s2399_s6 + $0xf8] sm:$0xff] }
 0x10e   : > { %v1714_v16 = vadd.f32 %v1511_v44, %v1339_v30  ;;  %v1272_v48 = vadd.f32 %v1240_v10, %v1204_v3  ;;  %vm753_vm3 = vcmp.ge.s32.totalorder %v505_v32, 1  ;;  %v1412_v56 = vmul.f32 %v3120_v20, %v3345_v4 }
 0x10f   : > { %v1480_v47 = vmul.f32 %v3124_v57, %v3332_v8  ;;  %v1548_v38 = vmul.f32 %v3128_v51, %v3353_v33  ;;  %v3413_v36 = vsel %vm753_vm3, %v864_v35, 0.0  ;;  %v1651_v61 = vmul.f32 %v3134_v62, %v3400_v27 }
 0x110   : > { %v1746_v29 = vadd.f32 %v1714_v16, %v1682_v26  ;;  %v1340_v34 = vadd.f32 %v1308_v14, %v1272_v48  ;;  %v1444_v45 = vadd.f32 %v1412_v56, %v1376_v17  ;;  %v1583_v37 = vmul.f32 %v3138_v59, %v3413_v36 }
 0x111   : > { %v286_v21 = vadd.s32 248, %v2409_v1  ;;  %v856_v58 = vrot.slane %v3386_v24, 7  ;;  %v1031_v11 = vrot.slane %v3421_v2, 1  ;;  %v1205_v42 = vmul.f32 %v3096_v63, %v3250_v0 }
 0x112   : > { %v1784_v46 = vadd.f32 %v3187_v28, %v1746_v29  ;;  %v1241_v22 = vmul.f32 %v3101_v54, %v3296_v52  ;;  %v1512_v25 = vadd.f32 %v1480_v47, %v1444_v45  ;;  %v1615_v15 = vadd.f32 %v1583_v37, %v1548_v38 }
 0x113   : > { %v512_v19 = vand.u32 15, %v286_v21  ;;  %v3432_v30 = vsel %vm859_vm0, %v855_v43, %v856_v58  ;;  %v1036_v39 = vsel %vm1033_vm1, %v1030_v13, %v1031_v11  ;;  %v1309_v18 = vmul.f32 %v3111_v9, %v3307_v60 }
 0x114   : > { %1816 = vst [vmem:[%s2557_s24 + $0xc8] sm:$0xff] %v1784_v46  ;;  %v1273_v41 = vadd.f32 %v1241_v22, %v1205_v42  ;;  %v1377_v0 = vmul.f32 %v3116_v5, %v3318_v55  ;;  %v1683_v12 = vadd.f32 %v1651_v61, %v1615_v15  ;;  %v1715_v52 = vadd.f32 %v1512_v25, %v1340_v34 }
 0x115   : > { %vm790_vm4 = vcmp.le.s32.totalorder %v512_v19, 14  ;;  %v1413_v50 = vmul.f32 %v3120_v20, %v3364_v31  ;;  %v1481_v13 = vmul.f32 %v3124_v57, %v3375_v40  ;;  %v1549_v60 = vmul.f32 %v3128_v51, %v3386_v24 }
 0x116   : > { %v3446_v6 = vsel %vm790_vm4, %v1036_v39, 0.0  ;;  %v1341_v43 = vadd.f32 %v1309_v18, %v1273_v41  ;;  %v1747_v3 = vadd.f32 %v1715_v52, %v1683_v12  ;;  %v1584_v44 = vmul.f32 %v3138_v59, %v3432_v30 }
 0x117   : > { %v1445_v23 = vadd.f32 %v1413_v50, %v1377_v0  ;;  %v1652_v7 = vmul.f32 %v3134_v62, %v3446_v6  ;;  %v287_v10 = vadd.s32 256, %v2409_v1  ;;  %v857_v32 = vrot.slane %v3421_v2, 7 }
 0x118   : > { %v1032_v35 = vrot.slane %v3444_v49, 1  ;;  %v1206_v14 = vmul.f32 %v3096_v63, %v3285_v53  ;;  %v1785_v26 = vadd.f32 %v3187_v28, %v1747_v3  ;;  %v1616_v48 = vadd.f32 %v1584_v44, %v1549_v60 }
 0x119   : > { %v1513_v16 = vadd.f32 %v1481_v13, %v1445_v23  ;;  %v1242_v17 = vmul.f32 %v3101_v54, %v3345_v4  ;;  %v519_v56 = vand.u32 15, %v287_v10  ;;  %v862_v47 = vsel %vm859_vm0, %v856_v58, %v857_v32 }
 0x11a   : > { %v1035_v38 = vsel %vm1033_vm1, %v1031_v11, %v1032_v35  ;;  %v1310_v29 = vmul.f32 %v3111_v9, %v3332_v8  ;;  %1817 = vst [vmem:[%s2557_s24 + $0xd0] sm:$0xff] %v1785_v26  ;;  %v1684_v34 = vadd.f32 %v1652_v7, %v1616_v48  ;;  %v1378_v45 = vmul.f32 %v3116_v5, %v3353_v33 }
 0x11b   : > { %v1716_v53 = vadd.f32 %v1513_v16, %v1341_v43  ;;  %v1274_v61 = vadd.f32 %v1242_v17, %v1206_v14  ;;  %vm755_vm5 = vcmp.ge.s32.totalorder %v519_v56, 1  ;;  %v1414_v4 = vmul.f32 %v3120_v20, %v3413_v36 }
 0x11c   : > { %v1482_v37 = vmul.f32 %v3124_v57, %v3400_v27  ;;  %v1550_v21 = vmul.f32 %v3128_v51, %v3421_v2  ;;  %v997_v8 = vsel %vm755_vm5, %v862_v47, 0.0  ;;  %v1653_v11 = vmul.f32 %v3134_v62, %v1035_v38 }
 0x11d   : > { %v1748_v58 = vadd.f32 %v1716_v53, %v1684_v34  ;;  %v1342_v46 = vadd.f32 %v1310_v29, %v1274_v61  ;;  %v1446_v42 = vadd.f32 %v1414_v4, %v1378_v45  ;;  %v1585_v22 = vmul.f32 %v3138_v59, %v997_v8 }
 0x11e   : > { %v288_v25 = vadd.s32 264, %v2409_v1  ;;  %v858_v15 = vrot.slane %v3444_v49, 7  ;;  %v1034_v39 = vsel %vm1033_vm1, %v1032_v35, 0.0  ;;  %v1207_v41 = vmul.f32 %v3096_v63, %v3318_v55 }
 0x11f   : > { %v1786_v19 = vadd.f32 %v3187_v28, %v1748_v58  ;;  %v1243_v18 = vmul.f32 %v3101_v54, %v3364_v31  ;;  %v1514_v0 = vadd.f32 %v1482_v37, %v1446_v42  ;;  %v1617_v12 = vadd.f32 %v1585_v22, %v1550_v21 }
 0x120   : > { %v526_v52 = vand.u32 15, %v288_v25  ;;  %v861_v50 = vsel %vm859_vm0, %v857_v32, %v858_v15  ;;  %v1311_v13 = vmul.f32 %v3111_v9, %v3375_v40  ;;  %v1379_v60 = vmul.f32 %v3116_v5, %v3386_v24 }
 0x121   : > { %1818 = vst [vmem:[%s2557_s24 + $0xd8] sm:$0xff] %v1786_v19  ;;  %v1275_v43 = vadd.f32 %v1243_v18, %v1207_v41  ;;  %v1415_v55 = vmul.f32 %v3120_v20, %v3432_v30  ;;  %v1685_v3 = vadd.f32 %v1653_v11, %v1617_v12  ;;  %v1717_v23 = vadd.f32 %v1514_v0, %v1342_v46 }
 0x122   : > { %vm792_vm1 = vcmp.le.s32.totalorder %v526_v52, 14  ;;  %v1483_v31 = vmul.f32 %v3124_v57, %v3446_v6  ;;  %v1551_v32 = vmul.f32 %v3128_v51, %v3444_v49  ;;  %v1586_v40 = vmul.f32 %v3138_v59, %v861_v50 }
 0x123   : > { %v1172_v44 = vsel %vm792_vm1, %v1034_v39, 0.0  ;;  %v1343_v7 = vadd.f32 %v1311_v13, %v1275_v43  ;;  %v1447_v10 = vadd.f32 %v1415_v55, %v1379_v60  ;;  %v1749_v35 = vadd.f32 %v1717_v23, %v1685_v3 }
 0x124   : > { %v1654_v14 = vmul.f32 %v3134_v62, %v1172_v44  ;;  %v289_v26 = vadd.s32 272, %v2409_v1  ;;  %v860_v48 = vsel %vm859_vm0, %v858_v15, 0.0  ;;  %v1208_v17 = vmul.f32 %v3096_v63, %v3353_v33 }
 0x125   : > { %v1515_v16 = vadd.f32 %v1483_v31, %v1447_v10  ;;  %v1244_v56 = vmul.f32 %v3101_v54, %v3413_v36  ;;  %v1787_v47 = vadd.f32 %v3187_v28, %v1749_v35  ;;  %v1618_v29 = vadd.f32 %v1586_v40, %v1551_v32 }
 0x126   : > { %v533_v34 = vand.u32 15, %v289_v26  ;;  %v1312_v53 = vmul.f32 %v3111_v9, %v3400_v27  ;;  %v1380_v4 = vmul.f32 %v3116_v5, %v3421_v2  ;;  %v1416_v1 = vmul.f32 %v3120_v20, %v997_v8 }
 0x127   : > { %v1718_v61 = vadd.f32 %v1515_v16, %v1343_v7  ;;  %v1276_v45 = vadd.f32 %v1244_v56, %v1208_v17  ;;  %1819 = vst [vmem:[%s2557_s24 + $0xe0] sm:$0xff] %v1787_v47  ;;  %v1686_v37 = vadd.f32 %v1654_v14, %v1618_v29  ;;  %v1484_v33 = vmul.f32 %v3124_v57, %v1035_v38 }
 0x128   : > { %vm757_vm0 = vcmp.ge.s32.totalorder %v533_v34, 1  ;;  %v1552_v36 = vmul.f32 0.0, %v3128_v51  ;;  %v1448_v46 = vadd.f32 %v1416_v1, %v1380_v4  ;;  %v1655_v11 = vmul.f32 0.0, %v3134_v62 }
 0x129   : > { %v999_v21 = vsel %vm757_vm0, %v860_v48, 0.0  ;;  %v1344_v58 = vadd.f32 %v1312_v53, %v1276_v45  ;;  %v1750_v27 = vadd.f32 %v1718_v61, %v1686_v37  ;;  %v1209_v2 = vmul.f32 %v3096_v63, %v3386_v24 }
 0x12a   : > { %v1587_v42 = vmul.f32 %v3138_v59, %v999_v21  ;;  %v1245_v8 = vmul.f32 %v3101_v54, %v3432_v30  ;;  %v1516_v22 = vadd.f32 %v1484_v33, %v1448_v46  ;;  %v1313_v38 = vmul.f32 %v3111_v9, %v3446_v6 }
 0x12b   : > { %v1381_v51 = vmul.f32 %v3116_v5, %v3444_v49  ;;  %v1417_v25 = vmul.f32 %v3120_v20, %v861_v50  ;;  %v1788_v62 = vadd.f32 %v3187_v28, %v1750_v27  ;;  %v1485_v63 = vmul.f32 %v3124_v57, %v1172_v44 }
 0x12c   : > { %v1619_v15 = vadd.f32 %v1587_v42, %v1552_v36  ;;  %v1277_v19 = vadd.f32 %v1245_v8, %v1209_v2  ;;  %v1719_v24 = vadd.f32 %v1516_v22, %v1344_v58  ;;  %v1588_v30 = vmul.f32 0.0, %v3138_v59 }
 0x12d   : > { %v1449_v54 = vadd.f32 %v1417_v25, %v1381_v51  ;;  %1820 = vst [vmem:[%s2557_s24 + $0xe8] sm:$0xff] %v1788_v62 }
 0x12e   : > { %v1687_v9 = vadd.f32 %v1655_v11, %v1619_v15  ;;  %v1345_v5 = vadd.f32 %v1313_v38, %v1277_v19  ;;  %v1620_v20 = vadd.f32 %v1588_v30, %v1552_v36 }
 0x12f   : > { %v1517_v49 = vadd.f32 %v1485_v63, %v1449_v54 }
 0x130   : > { %v1751_v6 = vadd.f32 %v1719_v24, %v1687_v9  ;;  %v1688_v39 = vadd.f32 %v1655_v11, %v1620_v20 }
 0x131   : > { %v1720_v41 = vadd.f32 %v1517_v49, %v1345_v5 }
 0x132   : > { %v1789_v57 = vadd.f32 %v3187_v28, %v1751_v6 }
 0x133   : > { %v1752_v18 = vadd.f32 %v1720_v41, %v1688_v39 }
 0x134   : > { %1821 = vst [vmem:[%s2557_s24 + $0xf0] sm:$0xff] %v1789_v57 }
 0x135   : > { %v1790_v59 = vadd.f32 %v3187_v28, %v1752_v18 }
 0x137   : > { %1822 = vst [vmem:[%s2557_s24 + $0xf8] sm:$0xff] %v1790_v59 }
 0x138   : > { %2137 = shalt.err (!%p2134_p5)
}
 0x139   : > { %s2138_s4 = scalar_lea.hbm %s3543_s8, 4096  ;;  %s2142_s22 = scalar_lea.hbm %s3599_s3, 8192 }
 0x13a   : > { %p2139_p9 = scmp.ne.s32.totalorder %s3543_s8, %s2138_s4  ;;  %p2143_p3 = scmp.lt.u32.totalorder %s3543_s8, %s3599_s3 }
 0x13b   : > { %p2144_p7 = scmp.lt.u32.totalorder %s2142_s22, %s2138_s4  ;;  %p2146_p4 = scmp.lt.u32.totalorder %s2138_s4, %s3543_s8 }
 0x13c   : > { %p2140_p1 = pnand %p2139_p9, %p2337_p10 }
 0x13d   : > { %p2145_p13 = por %p2144_p7, %p2143_p3 }
 0x13e   : > { %p2141_p2 = pneg %p2140_p1 }
 0x13f   : > { %p2147_p6 = por %p2146_p4, %p2145_p13 }
 0x141   : > { %p2148_p8 = pnand %p2147_p6, %p2141_p2 }
 0x143   : > { %2151 = shalt.err (!%p2148_p8)
}
 0x144   : > { %s2219_s10 = smov 128   ;;  %s2220_s11 = smov 8  }
 0x145   : > { %1983 = dma.vmem_to_hbm [thread:$0]  (%p2337_p10), %s3545_s18, 4096, %s3543_s8, %s1824_s21, %s2219_s10, %s2219_s10, %s2220_s11  }
 0x146 PF: > { %s1853_s26 = sand.u32 1, %s2190_s12   ;;  %p3623_p12 = scmp.ne.s32.totalorder %s3607_s23, 0 }
 0x147   : > { %p3624_p11 = scmp.ge.s32.totalorder %s2210_s17, 2  ;;  %s1854_s7 = scalar_lea.sflag [#allocation4], %s1853_s26 }
 0x149   : > { %p1994_p0 = pnand %p3624_p11, %p3623_p12 }
 0x14b   : > { %2185 = dma.done.wait (!%p1994_p0), %s1854_s7, 4096  }
 0x14c   : > { %2187 = vsyncadd (!%p1994_p0), %s1854_s7, 4294963200  ;;  %s20_s17 = sadd.s32 1, %s2210_s17   ;;  %s3625_s12 = smov %s2194_s13 }
 0x14d   : > { %p17_p5 = scmp.ge.s32.totalorder %s20_s17, 4   ;;  %s3626_s13 = smov %s2198_s14 }
 0x14e   : > { %s3627_s14 = smov %s2346_s5  ;;  %s3628_s15 = smov %s2206_s16 }
 0x14f   : > { %s3629_s16 = smov %s3631_s28  ;;  %19 = sbr.rel (!%p17_p5) target bundleno = 7 (0x7), region = 87 }
 0x156   :  { %1859 = vsyncpa [#allocation3], 1 }
 0x157   :  { %1861 = vsyncpa [#allocation3 + $0x1], 1 }
 0x158   :  { %1862 = vsyncpa [#allocation6], 1 }
 0x159   :  { %1863 = vsyncpa [#allocation4], 1 }
 0x15a   :  { %1865 = vsyncpa [#allocation4 + $0x1], 1 }

</bundles_post_ra>
